<compile_context>
chip_gen: v7x
topology: tpu7x:2x2x1
jax: 0.10.0
libtpu: 0.0.40
codegen_flags: <defaults>
</compile_context>

<pallas_src>
import jax
import jax.numpy as jnp
from jax import lax
from jax.experimental import pallas as pl
from jax.experimental.pallas import tpu as pltpu


def _bottleneck_kernel(xm_ref, xt_ref, xb_ref, w1_ref, b12_ref, w2_ref, w3_ref,
                       b3_ref, o_ref, hcol_ref, acc_ref):
    tH, W, Cin = xm_ref.shape             # interior row tile (no halo)
    C = w1_ref.shape[1]                   # out_channels
    Cexp = w3_ref.shape[1]                # 4 * out_channels

    t = pl.program_id(1)
    n_t = pl.num_programs(1)

    b1 = b12_ref[0:1, :]
    b2 = b12_ref[1:2, :]

    def conv1(x2d):
        """1x1 conv (BN scale pre-folded into w1) + bias + relu -> bf16."""
        h = jnp.dot(x2d, w1_ref[...], preferred_element_type=jnp.float32)
        return jnp.maximum(h + b1, 0.0).astype(jnp.bfloat16)

    def write_taps(r0, rn, h1):
        """Width-direction im2col: dx=-1/0/+1 taps of h1 (rn,W,C) into hcol rows [r0,r0+rn)."""
        hcol_ref[r0:r0 + rn, :, C:2 * C] = h1                               # dx = 0
        hcol_ref[r0:r0 + rn, 1:W, 0:C] = h1[:, :W - 1, :]                   # dx = -1
        hcol_ref[r0:r0 + rn, 0:1, 0:C] = jnp.zeros((rn, 1, C), jnp.bfloat16)
        hcol_ref[r0:r0 + rn, 0:W - 1, 2 * C:3 * C] = h1[:, 1:, :]           # dx = +1
        hcol_ref[r0:r0 + rn, W - 1:W, 2 * C:3 * C] = jnp.zeros((rn, 1, C), jnp.bfloat16)

    # --- conv1 + bn1 + relu on the tH interior rows -> hcol rows 1..tH -------
    h1m = conv1(xm_ref[...].reshape(tH * W, Cin)).reshape(tH, W, C)
    write_taps(1, tH, h1m)

    # --- halo rows: boundary-only work under pl.when --------------------------
    # 3x3 SAME padding applies to the conv1 *output*, and conv1(0)=relu(b1)!=0,
    # so out-of-image halo rows must be exact zeros in hcol.
    @pl.when(t > 0)
    def _():
        write_taps(0, 1, conv1(xt_ref[...].reshape(W, Cin)).reshape(1, W, C))

    @pl.when(t == 0)
    def _():
        hcol_ref[0:1, :, :] = jnp.zeros((1, W, 3 * C), jnp.bfloat16)

    @pl.when(t < n_t - 1)
    def _():
        write_taps(tH + 1, 1, conv1(xb_ref[...].reshape(W, Cin)).reshape(1, W, C))

    @pl.when(t == n_t - 1)
    def _():
        hcol_ref[tH + 1:tH + 2, :, :] = jnp.zeros((1, W, 3 * C), jnp.bfloat16)

    # --- conv2 (3x3, stride 1, pad 1) + bn2 + relu ----------------------------
    # 3 MXU matmuls with K = 3*C; dy offsets are leading-dim slices of hcol.
    acc_ref[...] = jnp.dot(hcol_ref[0:tH].reshape(tH * W, 3 * C), w2_ref[0],
                           preferred_element_type=jnp.float32)
    acc_ref[...] += jnp.dot(hcol_ref[1:tH + 1].reshape(tH * W, 3 * C), w2_ref[1],
                            preferred_element_type=jnp.float32)
    acc_ref[...] += jnp.dot(hcol_ref[2:tH + 2].reshape(tH * W, 3 * C), w2_ref[2],
                            preferred_element_type=jnp.float32)
    h2 = jnp.maximum(acc_ref[...] + b2, 0.0).astype(jnp.bfloat16)

    # --- conv3 (1x1) + bn3 + residual add (f32) + relu ------------------------
    h3 = jnp.dot(h2, w3_ref[...], preferred_element_type=jnp.float32) + b3_ref[...]
    identity = xm_ref[...].astype(jnp.float32).reshape(tH * W, Cin)
    out = jnp.maximum(h3 + identity, 0.0)
    o_ref[...] = out.reshape(tH, W, Cexp).astype(o_ref.dtype)


def _per_step_vmem_bytes(tile_h, W, Cin, Cout, Cexp):
    """Rough per-grid-step VMEM footprint (double-buffered blocks + scratch + temps)."""
    bf, f32 = 2, 4
    x_blk = tile_h * W * Cin * bf
    halo = 2 * W * Cin * bf
    out_blk = tile_h * W * Cexp * bf
    hcol = (tile_h + 2) * W * 3 * Cout * bf
    acc = tile_h * W * Cout * f32
    wts = (Cin * Cout + 9 * Cout * Cout + Cout * Cexp) * bf + (2 * Cout + Cexp) * f32
    temps = (tile_h + 2) * W * Cout * (f32 + bf) + tile_h * W * Cexp * f32
    return 2 * (x_blk + halo + out_blk + wts) + hcol + acc + temps


def _auto_tile_h(H, W, Cin, Cout, Cexp, N, budget_bytes=16 << 20):
    """Largest row tile within the VMEM budget; keep >=2 grid steps for v7x megacore."""
    for d in [d for d in range(H, 0, -1) if H % d == 0]:
        if _per_step_vmem_bytes(d, W, Cin, Cout, Cexp) > budget_bytes:
            continue
        if N * (H // d) >= 2 or d == 1:
            return d
    return 1


def bottleneck_block(x_nchw, params, *, tile_h=None):
    """Pallas implementation of `block.forward` (identity_downsample=None, stride=1)."""
    w1, w2r, w3 = params["w1"], params["w2r"], params["w3"]
    b12, b3 = params["b12"], params["b3"]

    # bf16 at the kernel boundary; the (layout-only) NCHW->NHWC transpose moves bf16.
    x = jnp.transpose(x_nchw.astype(jnp.bfloat16), (0, 2, 3, 1))
    N, H, W, Cin = x.shape
    Cout = w1.shape[1]
    Cexp = w3.shape[1]
    assert Cin == Cexp, "identity_downsample=None requires in_channels == 4*out_channels"

    if tile_h is None:
        tH = _auto_tile_h(H, W, Cin, Cout, Cexp, N)
    elif tile_h <= H and H % tile_h == 0:
        tH = tile_h
    else:
        tH = H
    nT = H // tH

    # x is passed three times: the tH-row interior block plus two 1-row halo
    # views whose index maps clamp at the image border (the kernel zeroes those
    # rows under pl.when, since 3x3 SAME padding applies to conv1's output).
    grid_spec = pltpu.PrefetchScalarGridSpec(
        num_scalar_prefetch=0,
        grid=(N, nT),
        in_specs=[
            pl.BlockSpec((None, tH, W, Cin), lambda n, t: (n, t, 0, 0)),
            pl.BlockSpec((None, 1, W, Cin),
                         lambda n, t: (n, jnp.maximum(t * tH - 1, 0), 0, 0)),
            pl.BlockSpec((None, 1, W, Cin),
                         lambda n, t: (n, jnp.minimum(t * tH + tH, H - 1), 0, 0)),
            pl.BlockSpec(w1.shape, lambda n, t: (0, 0)),
            pl.BlockSpec(b12.shape, lambda n, t: (0, 0)),
            pl.BlockSpec(w2r.shape, lambda n, t: (0, 0, 0)),
            pl.BlockSpec(w3.shape, lambda n, t: (0, 0)),
            pl.BlockSpec(b3.shape, lambda n, t: (0, 0)),
        ],
        out_specs=pl.BlockSpec((None, tH, W, Cexp), lambda n, t: (n, t, 0, 0)),
        scratch_shapes=[
            pltpu.VMEM((tH + 2, W, 3 * Cout), jnp.bfloat16),   # im2col(W) of h1
            pltpu.VMEM((tH * W, Cout), jnp.float32),           # conv2 accumulator
        ],
    )

    # Right-size the scoped-VMEM limit from the footprint: floor leaves room for
    # Mosaic internal scratch; cap stays under v7x's 64 MiB physical per TC.
    foot = _per_step_vmem_bytes(tH, W, Cin, Cout, Cexp)
    vmem_limit = int(min(max(3 * foot // 2 + (4 << 20), 32 << 20), 56 << 20))

    out = pl.pallas_call(
        _bottleneck_kernel,
        out_shape=jax.ShapeDtypeStruct((N, H, W, Cexp), jnp.bfloat16),
        grid_spec=grid_spec,
        compiler_params=pltpu.CompilerParams(
            dimension_semantics=("parallel", "parallel"),
            vmem_limit_bytes=vmem_limit,
        ),
    )(x, x, x, w1, b12, w2r, w3, b3)

    # NHWC -> NCHW (bf16).  In a real network keep NHWC end-to-end and drop this.
    return jnp.transpose(out, (0, 3, 1, 2))


def init_params(key, in_channels, out_channels, expansion=4, eps=1e-5):
    """Deterministic synthetic parameters with BN folded into (weights, bias).

    BN scale is folded into the conv weights in f32, then cast to bf16 (MXU
    inference numerics); the folded biases stay f32.
    """
    cexp = out_channels * expansion
    ks = jax.random.split(key, 18)

    def conv_w(k, shape, fan_in):
        return jax.random.normal(k, shape, jnp.float32) / jnp.sqrt(float(fan_in))

    # Channels-last matmul layout (PyTorch (Cout,Cin,kH,kW) <-> (kH,kW,Cin,Cout)).
    w1 = conv_w(ks[0], (in_channels, out_channels), in_channels)                 # 1x1
    w2 = conv_w(ks[1], (3, 3, out_channels, out_channels), 9 * out_channels)     # 3x3 HWIO
    w3 = conv_w(ks[2], (out_channels, cexp), out_channels)                       # 1x1
    cb1 = 0.1 * jax.random.normal(ks[3], (out_channels,), jnp.float32)
    cb2 = 0.1 * jax.random.normal(ks[4], (out_channels,), jnp.float32)
    cb3 = 0.1 * jax.random.normal(ks[5], (cexp,), jnp.float32)

    def bn(kg, kb, km, kv, c):
        gamma = 1.0 + 0.1 * jax.random.normal(kg, (c,), jnp.float32)
        beta = 0.1 * jax.random.normal(kb, (c,), jnp.float32)
        mean = 0.1 * jax.random.normal(km, (c,), jnp.float32)
        var = jax.random.uniform(kv, (c,), jnp.float32, minval=0.5, maxval=1.5)
        return gamma, beta, mean, var

    bn1 = bn(ks[6], ks[7], ks[8], ks[9], out_channels)
    bn2 = bn(ks[10], ks[11], ks[12], ks[13], out_channels)
    bn3 = bn(ks[14], ks[15], ks[16], ks[17], cexp)

    def fold(gamma, beta, mean, var, conv_bias):
        scale = gamma * lax.rsqrt(var + eps)
        bias = beta + scale * (conv_bias - mean)
        return scale, bias

    s1, b1 = fold(*bn1, cb1)
    s2, b2 = fold(*bn2, cb2)
    s3, b3 = fold(*bn3, cb3)

    w1s = (w1 * s1[None, :]).astype(jnp.bfloat16)
    w2s = (w2 * s2[None, None, None, :]).astype(jnp.bfloat16)
    w3s = (w3 * s3[None, :]).astype(jnp.bfloat16)
    return dict(
        w1=w1s,
        w2=w2s,                                                    # HWIO (reference)
        w2r=w2s.reshape(3, 3 * out_channels, out_channels),        # (dy, dx*Cin, Cout)
        w3=w3s,
        b12=jnp.stack([b1, b2], axis=0),                           # (2, C) f32
        b3=b3[None, :],                                            # (1, 4C) f32
    )


def reference_forward(x_nchw, p):
    """Pure-JAX f32 reference of the same forward pass (same bf16 weights/input)."""
    x = jnp.transpose(x_nchw.astype(jnp.bfloat16).astype(jnp.float32), (0, 2, 3, 1))
    w1 = p["w1"].astype(jnp.float32)
    w2 = p["w2"].astype(jnp.float32)
    w3 = p["w3"].astype(jnp.float32)
    b1, b2 = p["b12"][0], p["b12"][1]
    b3 = p["b3"][0]
    h = jnp.maximum(jnp.einsum("nhwc,cd->nhwd", x, w1) + b1, 0.0)
    h = lax.conv_general_dilated(h, w2, (1, 1), "SAME",
                                 dimension_numbers=("NHWC", "HWIO", "NHWC"))
    h = jnp.maximum(h + b2, 0.0)
    h = jnp.einsum("nhwc,cd->nhwd", h, w3) + b3
    out = jnp.maximum(h + x, 0.0)
    return jnp.transpose(out, (0, 3, 1, 2))


if __name__ == "__main__":
    key = jax.random.PRNGKey(0)
    kx, kp = jax.random.split(key)

    # in_channels must equal out_channels * expansion when identity_downsample is None.
    N, Cin, H, W = 2, 16, 16, 16
    Cout = 4                                       # block's out_channels; final = 4*Cout = Cin

    x = jax.random.normal(kx, (N, Cin, H, W), jnp.float32)
    params = init_params(kp, Cin, Cout)
    ref = reference_forward(x, params)

    # tile_h=4 exercises the boundary + interior halo paths; tile_h=None takes
    # the auto (large-tile) path.
    for th in (4, None):
        out = jax.block_until_ready(bottleneck_block(x, params, tile_h=th))
        assert out.shape == (N, Cout * 4, H, W), out.shape
        err = float(jnp.max(jnp.abs(out.astype(jnp.float32) - ref)))
        assert err < 1e-1, f"tile_h={th}: max abs error vs reference: {err}"

    print("KERNEL_OK")
</pallas_src>

<mosaic_0001>
module attributes {stable_mosaic.version = 11 : i64} {
  func.func @_bottleneck_kernel(%arg0: i32, %arg1: i32, %arg2: memref<1x4x16x16xbf16, #tpu.memory_space<vmem>>, %arg3: memref<1x1x16x16xbf16, #tpu.memory_space<vmem>>, %arg4: memref<1x1x16x16xbf16, #tpu.memory_space<vmem>>, %arg5: memref<16x4xbf16, #tpu.memory_space<vmem>>, %arg6: memref<2x4xf32, #tpu.memory_space<vmem>>, %arg7: memref<3x12x4xbf16, #tpu.memory_space<vmem>>, %arg8: memref<4x16xbf16, #tpu.memory_space<vmem>>, %arg9: memref<1x16xf32, #tpu.memory_space<vmem>>, %arg10: memref<1x4x16x16xbf16, #tpu.memory_space<vmem>>, %arg11: memref<6x16x12xbf16, #tpu.memory_space<vmem>>, %arg12: memref<64x4xf32, #tpu.memory_space<vmem>>) attributes {dimension_semantics = [#tpu.dimension_semantics<parallel>, #tpu.dimension_semantics<parallel>], iteration_bounds = array<i64: 2, 4>, scalar_prefetch = 0 : i64, scratch_operands = 2 : i64, tpu.core_type = #tpu.core_type<tc>, window_params = [{transform_indices = @transform_0, window_bounds = array<i64: 1, 4, 16, 16>}, {transform_indices = @transform_1, window_bounds = array<i64: 1, 1, 16, 16>}, {transform_indices = @transform_2, window_bounds = array<i64: 1, 1, 16, 16>}, {pipeline_mode = #tpu.pipeline_mode<synchronous>, transform_indices = @transform_3, window_bounds = array<i64: 16, 4>}, {pipeline_mode = #tpu.pipeline_mode<synchronous>, transform_indices = @transform_4, window_bounds = array<i64: 2, 4>}, {pipeline_mode = #tpu.pipeline_mode<synchronous>, transform_indices = @transform_5, window_bounds = array<i64: 3, 12, 4>}, {pipeline_mode = #tpu.pipeline_mode<synchronous>, transform_indices = @transform_6, window_bounds = array<i64: 4, 16>}, {pipeline_mode = #tpu.pipeline_mode<synchronous>, transform_indices = @transform_7, window_bounds = array<i64: 1, 16>}, {transform_indices = @transform_8, window_bounds = array<i64: 1, 4, 16, 16>}]} {
    %c0 = arith.constant 0 : index
    %c0_0 = arith.constant 0 : index
    %0 = vector.load %arg6[%c0, %c0_0] : memref<2x4xf32, #tpu.memory_space<vmem>>, vector<1x4xf32>
    %c1 = arith.constant 1 : index
    %c0_1 = arith.constant 0 : index
    %1 = vector.load %arg6[%c1, %c0_1] : memref<2x4xf32, #tpu.memory_space<vmem>>, vector<1x4xf32>
    %c0_2 = arith.constant 0 : index
    %c0_3 = arith.constant 0 : index
    %c0_4 = arith.constant 0 : index
    %c0_5 = arith.constant 0 : index
    %2 = vector.load %arg2[%c0_2, %c0_3, %c0_4, %c0_5] : memref<1x4x16x16xbf16, #tpu.memory_space<vmem>>, vector<1x4x16x16xbf16>
    %3 = vector.shape_cast %2 : vector<1x4x16x16xbf16> to vector<4x16x16xbf16>
    %4 = vector.shape_cast %3 : vector<4x16x16xbf16> to vector<64x16xbf16>
    %c0_6 = arith.constant 0 : index
    %c0_7 = arith.constant 0 : index
    %5 = vector.load %arg5[%c0_6, %c0_7] : memref<16x4xbf16, #tpu.memory_space<vmem>>, vector<16x4xbf16>
    %cst = arith.constant dense<0.000000e+00> : vector<64x4xf32>
    %6 = tpu.matmul %4, %5, %cst {dimension_numbers = #tpu.dot_dimension_numbers<[1], [0], [0], [1], [0, 0, 1, 1], [], []>} : vector<64x16xbf16>, vector<16x4xbf16>, vector<64x4xf32> -> vector<64x4xf32>
    %7 = vector.broadcast %0 : vector<1x4xf32> to vector<64x4xf32>
    %8 = arith.addf %6, %7 : vector<64x4xf32>
    %cst_8 = arith.constant 0.000000e+00 : f32
    %9 = vector.broadcast %cst_8 : f32 to vector<64x4xf32>
    %10 = arith.maximumf %8, %9 : vector<64x4xf32>
    %11 = arith.truncf %10 : vector<64x4xf32> to vector<64x4xbf16>
    %12 = vector.shape_cast %11 : vector<64x4xbf16> to vector<4x16x4xbf16>
    %c1_9 = arith.constant 1 : index
    %c0_10 = arith.constant 0 : index
    %c4 = arith.constant 4 : index
    %13 = vector.load %arg11[%c1_9, %c0_10, %c4] : memref<6x16x12xbf16, #tpu.memory_space<vmem>>, vector<4x16x4xbf16>
    tpu.vector_store %arg11[%c1_9, %c0_10, %c4], %12 {strides = array<i32>} : memref<6x16x12xbf16, #tpu.memory_space<vmem>>, vector<4x16x4xbf16>,
    %14 = vector.extract_strided_slice %12 {offsets = [0, 0, 0], sizes = [4, 15, 4], strides = [1, 1, 1]} : vector<4x16x4xbf16> to vector<4x15x4xbf16>
    %c1_11 = arith.constant 1 : index
    %c1_12 = arith.constant 1 : index
    %c0_13 = arith.constant 0 : index
    %15 = vector.load %arg11[%c1_11, %c1_12, %c0_13] : memref<6x16x12xbf16, #tpu.memory_space<vmem>>, vector<4x15x4xbf16>
    tpu.vector_store %arg11[%c1_11, %c1_12, %c0_13], %14 {strides = array<i32>} : memref<6x16x12xbf16, #tpu.memory_space<vmem>>, vector<4x15x4xbf16>,
    %cst_14 = arith.constant 0.000000e+00 : bf16
    %16 = vector.broadcast %cst_14 : bf16 to vector<4x1x4xbf16>
    %c1_15 = arith.constant 1 : index
    %c0_16 = arith.constant 0 : index
    %c0_17 = arith.constant 0 : index
    %17 = vector.load %arg11[%c1_15, %c0_16, %c0_17] : memref<6x16x12xbf16, #tpu.memory_space<vmem>>, vector<4x1x4xbf16>
    tpu.vector_store %arg11[%c1_15, %c0_16, %c0_17], %16 {strides = array<i32>} : memref<6x16x12xbf16, #tpu.memory_space<vmem>>, vector<4x1x4xbf16>,
    %18 = vector.extract_strided_slice %12 {offsets = [0, 1, 0], sizes = [4, 15, 4], strides = [1, 1, 1]} : vector<4x16x4xbf16> to vector<4x15x4xbf16>
    %c1_18 = arith.constant 1 : index
    %c0_19 = arith.constant 0 : index
    %c8 = arith.constant 8 : index
    %19 = vector.load %arg11[%c1_18, %c0_19, %c8] : memref<6x16x12xbf16, #tpu.memory_space<vmem>>, vector<4x15x4xbf16>
    tpu.vector_store %arg11[%c1_18, %c0_19, %c8], %18 {strides = array<i32>} : memref<6x16x12xbf16, #tpu.memory_space<vmem>>, vector<4x15x4xbf16>,
    %cst_20 = arith.constant 0.000000e+00 : bf16
    %20 = vector.broadcast %cst_20 : bf16 to vector<4x1x4xbf16>
    %c1_21 = arith.constant 1 : index
    %c15 = arith.constant 15 : index
    %c8_22 = arith.constant 8 : index
    %21 = vector.load %arg11[%c1_21, %c15, %c8_22] : memref<6x16x12xbf16, #tpu.memory_space<vmem>>, vector<4x1x4xbf16>
    tpu.vector_store %arg11[%c1_21, %c15, %c8_22], %20 {strides = array<i32>} : memref<6x16x12xbf16, #tpu.memory_space<vmem>>, vector<4x1x4xbf16>,
    %c0_i32 = arith.constant 0 : i32
    %22 = arith.cmpi sgt, %arg1, %c0_i32 : i32
    %23 = arith.extui %22 : i1 to i32
    %c0_i32_23 = arith.constant 0 : i32
    %24 = arith.cmpi ne, %23, %c0_i32_23 : i32
    scf.if %24 {
      %c0_76 = arith.constant 0 : index
      %c0_77 = arith.constant 0 : index
      %c0_78 = arith.constant 0 : index
      %c0_79 = arith.constant 0 : index
      %79 = vector.load %arg3[%c0_76, %c0_77, %c0_78, %c0_79] : memref<1x1x16x16xbf16, #tpu.memory_space<vmem>>, vector<1x1x16x16xbf16>
      %80 = vector.shape_cast %79 : vector<1x1x16x16xbf16> to vector<1x16x16xbf16>
      %81 = vector.shape_cast %80 : vector<1x16x16xbf16> to vector<16x16xbf16>
      %c0_80 = arith.constant 0 : index
      %c0_81 = arith.constant 0 : index
      %82 = vector.load %arg5[%c0_80, %c0_81] : memref<16x4xbf16, #tpu.memory_space<vmem>>, vector<16x4xbf16>
      %cst_82 = arith.constant dense<0.000000e+00> : vector<16x4xf32>
      %83 = tpu.matmul %81, %82, %cst_82 {dimension_numbers = #tpu.dot_dimension_numbers<[1], [0], [0], [1], [0, 0, 1, 1], [], []>} : vector<16x16xbf16>, vector<16x4xbf16>, vector<16x4xf32> -> vector<16x4xf32>
      %84 = vector.broadcast %0 : vector<1x4xf32> to vector<16x4xf32>
      %85 = arith.addf %83, %84 : vector<16x4xf32>
      %cst_83 = arith.constant 0.000000e+00 : f32
      %86 = vector.broadcast %cst_83 : f32 to vector<16x4xf32>
      %87 = arith.maximumf %85, %86 : vector<16x4xf32>
      %88 = arith.truncf %87 : vector<16x4xf32> to vector<16x4xbf16>
      %89 = vector.shape_cast %88 : vector<16x4xbf16> to vector<1x16x4xbf16>
      %c0_84 = arith.constant 0 : index
      %c0_85 = arith.constant 0 : index
      %c4_86 = arith.constant 4 : index
      %90 = vector.load %arg11[%c0_84, %c0_85, %c4_86] : memref<6x16x12xbf16, #tpu.memory_space<vmem>>, vector<1x16x4xbf16>
      tpu.vector_store %arg11[%c0_84, %c0_85, %c4_86], %89 {strides = array<i32>} : memref<6x16x12xbf16, #tpu.memory_space<vmem>>, vector<1x16x4xbf16>,
      %91 = vector.extract_strided_slice %89 {offsets = [0, 0, 0], sizes = [1, 15, 4], strides = [1, 1, 1]} : vector<1x16x4xbf16> to vector<1x15x4xbf16>
      %c0_87 = arith.constant 0 : index
      %c1_88 = arith.constant 1 : index
      %c0_89 = arith.constant 0 : index
      %92 = vector.load %arg11[%c0_87, %c1_88, %c0_89] : memref<6x16x12xbf16, #tpu.memory_space<vmem>>, vector<1x15x4xbf16>
      tpu.vector_store %arg11[%c0_87, %c1_88, %c0_89], %91 {strides = array<i32>} : memref<6x16x12xbf16, #tpu.memory_space<vmem>>, vector<1x15x4xbf16>,
      %cst_90 = arith.constant 0.000000e+00 : bf16
      %93 = vector.broadcast %cst_90 : bf16 to vector<1x1x4xbf16>
      %c0_91 = arith.constant 0 : index
      %c0_92 = arith.constant 0 : index
      %c0_93 = arith.constant 0 : index
      %94 = vector.load %arg11[%c0_91, %c0_92, %c0_93] : memref<6x16x12xbf16, #tpu.memory_space<vmem>>, vector<1x1x4xbf16>
      tpu.vector_store %arg11[%c0_91, %c0_92, %c0_93], %93 {strides = array<i32>} : memref<6x16x12xbf16, #tpu.memory_space<vmem>>, vector<1x1x4xbf16>,
      %95 = vector.extract_strided_slice %89 {offsets = [0, 1, 0], sizes = [1, 15, 4], strides = [1, 1, 1]} : vector<1x16x4xbf16> to vector<1x15x4xbf16>
      %c0_94 = arith.constant 0 : index
      %c0_95 = arith.constant 0 : index
      %c8_96 = arith.constant 8 : index
      %96 = vector.load %arg11[%c0_94, %c0_95, %c8_96] : memref<6x16x12xbf16, #tpu.memory_space<vmem>>, vector<1x15x4xbf16>
      tpu.vector_store %arg11[%c0_94, %c0_95, %c8_96], %95 {strides = array<i32>} : memref<6x16x12xbf16, #tpu.memory_space<vmem>>, vector<1x15x4xbf16>,
      %cst_97 = arith.constant 0.000000e+00 : bf16
      %97 = vector.broadcast %cst_97 : bf16 to vector<1x1x4xbf16>
      %c0_98 = arith.constant 0 : index
      %c15_99 = arith.constant 15 : index
      %c8_100 = arith.constant 8 : index
      %98 = vector.load %arg11[%c0_98, %c15_99, %c8_100] : memref<6x16x12xbf16, #tpu.memory_space<vmem>>, vector<1x1x4xbf16>
      tpu.vector_store %arg11[%c0_98, %c15_99, %c8_100], %97 {strides = array<i32>} : memref<6x16x12xbf16, #tpu.memory_space<vmem>>, vector<1x1x4xbf16>,
    } else {
    }
    %c0_i32_24 = arith.constant 0 : i32
    %25 = arith.cmpi eq, %arg1, %c0_i32_24 : i32
    %26 = arith.extui %25 : i1 to i32
    %c0_i32_25 = arith.constant 0 : i32
    %27 = arith.cmpi ne, %26, %c0_i32_25 : i32
    scf.if %27 {
      %cst_76 = arith.constant 0.000000e+00 : bf16
      %79 = vector.broadcast %cst_76 : bf16 to vector<1x16x12xbf16>
      %c0_77 = arith.constant 0 : index
      %c0_78 = arith.constant 0 : index
      %c0_79 = arith.constant 0 : index
      %80 = vector.load %arg11[%c0_77, %c0_78, %c0_79] : memref<6x16x12xbf16, #tpu.memory_space<vmem>>, vector<1x16x12xbf16>
      tpu.vector_store %arg11[%c0_77, %c0_78, %c0_79], %79 {strides = array<i32>} : memref<6x16x12xbf16, #tpu.memory_space<vmem>>, vector<1x16x12xbf16>,
    } else {
    }
    %c3_i32 = arith.constant 3 : i32
    %28 = arith.cmpi slt, %arg1, %c3_i32 : i32
    %29 = arith.extui %28 : i1 to i32
    %c0_i32_26 = arith.constant 0 : i32
    %30 = arith.cmpi ne, %29, %c0_i32_26 : i32
    scf.if %30 {
      %c0_76 = arith.constant 0 : index
      %c0_77 = arith.constant 0 : index
      %c0_78 = arith.constant 0 : index
      %c0_79 = arith.constant 0 : index
      %79 = vector.load %arg4[%c0_76, %c0_77, %c0_78, %c0_79] : memref<1x1x16x16xbf16, #tpu.memory_space<vmem>>, vector<1x1x16x16xbf16>
      %80 = vector.shape_cast %79 : vector<1x1x16x16xbf16> to vector<1x16x16xbf16>
      %81 = vector.shape_cast %80 : vector<1x16x16xbf16> to vector<16x16xbf16>
      %c0_80 = arith.constant 0 : index
      %c0_81 = arith.constant 0 : index
      %82 = vector.load %arg5[%c0_80, %c0_81] : memref<16x4xbf16, #tpu.memory_space<vmem>>, vector<16x4xbf16>
      %cst_82 = arith.constant dense<0.000000e+00> : vector<16x4xf32>
      %83 = tpu.matmul %81, %82, %cst_82 {dimension_numbers = #tpu.dot_dimension_numbers<[1], [0], [0], [1], [0, 0, 1, 1], [], []>} : vector<16x16xbf16>, vector<16x4xbf16>, vector<16x4xf32> -> vector<16x4xf32>
      %84 = vector.broadcast %0 : vector<1x4xf32> to vector<16x4xf32>
      %85 = arith.addf %83, %84 : vector<16x4xf32>
      %cst_83 = arith.constant 0.000000e+00 : f32
      %86 = vector.broadcast %cst_83 : f32 to vector<16x4xf32>
      %87 = arith.maximumf %85, %86 : vector<16x4xf32>
      %88 = arith.truncf %87 : vector<16x4xf32> to vector<16x4xbf16>
      %89 = vector.shape_cast %88 : vector<16x4xbf16> to vector<1x16x4xbf16>
      %c5 = arith.constant 5 : index
      %c0_84 = arith.constant 0 : index
      %c4_85 = arith.constant 4 : index
      %90 = vector.load %arg11[%c5, %c0_84, %c4_85] : memref<6x16x12xbf16, #tpu.memory_space<vmem>>, vector<1x16x4xbf16>
      tpu.vector_store %arg11[%c5, %c0_84, %c4_85], %89 {strides = array<i32>} : memref<6x16x12xbf16, #tpu.memory_space<vmem>>, vector<1x16x4xbf16>,
      %91 = vector.extract_strided_slice %89 {offsets = [0, 0, 0], sizes = [1, 15, 4], strides = [1, 1, 1]} : vector<1x16x4xbf16> to vector<1x15x4xbf16>
      %c5_86 = arith.constant 5 : index
      %c1_87 = arith.constant 1 : index
      %c0_88 = arith.constant 0 : index
      %92 = vector.load %arg11[%c5_86, %c1_87, %c0_88] : memref<6x16x12xbf16, #tpu.memory_space<vmem>>, vector<1x15x4xbf16>
      tpu.vector_store %arg11[%c5_86, %c1_87, %c0_88], %91 {strides = array<i32>} : memref<6x16x12xbf16, #tpu.memory_space<vmem>>, vector<1x15x4xbf16>,
      %cst_89 = arith.constant 0.000000e+00 : bf16
      %93 = vector.broadcast %cst_89 : bf16 to vector<1x1x4xbf16>
      %c5_90 = arith.constant 5 : index
      %c0_91 = arith.constant 0 : index
      %c0_92 = arith.constant 0 : index
      %94 = vector.load %arg11[%c5_90, %c0_91, %c0_92] : memref<6x16x12xbf16, #tpu.memory_space<vmem>>, vector<1x1x4xbf16>
      tpu.vector_store %arg11[%c5_90, %c0_91, %c0_92], %93 {strides = array<i32>} : memref<6x16x12xbf16, #tpu.memory_space<vmem>>, vector<1x1x4xbf16>,
      %95 = vector.extract_strided_slice %89 {offsets = [0, 1, 0], sizes = [1, 15, 4], strides = [1, 1, 1]} : vector<1x16x4xbf16> to vector<1x15x4xbf16>
      %c5_93 = arith.constant 5 : index
      %c0_94 = arith.constant 0 : index
      %c8_95 = arith.constant 8 : index
      %96 = vector.load %arg11[%c5_93, %c0_94, %c8_95] : memref<6x16x12xbf16, #tpu.memory_space<vmem>>, vector<1x15x4xbf16>
      tpu.vector_store %arg11[%c5_93, %c0_94, %c8_95], %95 {strides = array<i32>} : memref<6x16x12xbf16, #tpu.memory_space<vmem>>, vector<1x15x4xbf16>,
      %cst_96 = arith.constant 0.000000e+00 : bf16
      %97 = vector.broadcast %cst_96 : bf16 to vector<1x1x4xbf16>
      %c5_97 = arith.constant 5 : index
      %c15_98 = arith.constant 15 : index
      %c8_99 = arith.constant 8 : index
      %98 = vector.load %arg11[%c5_97, %c15_98, %c8_99] : memref<6x16x12xbf16, #tpu.memory_space<vmem>>, vector<1x1x4xbf16>
      tpu.vector_store %arg11[%c5_97, %c15_98, %c8_99], %97 {strides = array<i32>} : memref<6x16x12xbf16, #tpu.memory_space<vmem>>, vector<1x1x4xbf16>,
    } else {
    }
    %c3_i32_27 = arith.constant 3 : i32
    %31 = arith.cmpi eq, %arg1, %c3_i32_27 : i32
    %32 = arith.extui %31 : i1 to i32
    %c0_i32_28 = arith.constant 0 : i32
    %33 = arith.cmpi ne, %32, %c0_i32_28 : i32
    scf.if %33 {
      %cst_76 = arith.constant 0.000000e+00 : bf16
      %79 = vector.broadcast %cst_76 : bf16 to vector<1x16x12xbf16>
      %c5 = arith.constant 5 : index
      %c0_77 = arith.constant 0 : index
      %c0_78 = arith.constant 0 : index
      %80 = vector.load %arg11[%c5, %c0_77, %c0_78] : memref<6x16x12xbf16, #tpu.memory_space<vmem>>, vector<1x16x12xbf16>
      tpu.vector_store %arg11[%c5, %c0_77, %c0_78], %79 {strides = array<i32>} : memref<6x16x12xbf16, #tpu.memory_space<vmem>>, vector<1x16x12xbf16>,
    } else {
    }
    %c0_29 = arith.constant 0 : index
    %c0_30 = arith.constant 0 : index
    %c0_31 = arith.constant 0 : index
    %34 = vector.load %arg11[%c0_29, %c0_30, %c0_31] : memref<6x16x12xbf16, #tpu.memory_space<vmem>>, vector<4x16x12xbf16>
    %35 = vector.shape_cast %34 : vector<4x16x12xbf16> to vector<64x12xbf16>
    %c0_32 = arith.constant 0 : index
    %c0_33 = arith.constant 0 : index
    %c0_34 = arith.constant 0 : index
    %36 = vector.load %arg7[%c0_32, %c0_33, %c0_34] : memref<3x12x4xbf16, #tpu.memory_space<vmem>>, vector<1x12x4xbf16>
    %37 = vector.shape_cast %36 : vector<1x12x4xbf16> to vector<12x4xbf16>
    %cst_35 = arith.constant dense<0.000000e+00> : vector<64x4xf32>
    %38 = tpu.matmul %35, %37, %cst_35 {dimension_numbers = #tpu.dot_dimension_numbers<[1], [0], [0], [1], [0, 0, 1, 1], [], []>} : vector<64x12xbf16>, vector<12x4xbf16>, vector<64x4xf32> -> vector<64x4xf32>
    %c0_36 = arith.constant 0 : index
    %c0_37 = arith.constant 0 : index
    %39 = vector.load %arg12[%c0_36, %c0_37] : memref<64x4xf32, #tpu.memory_space<vmem>>, vector<64x4xf32>
    tpu.vector_store %arg12[%c0_36, %c0_37], %38 {strides = array<i32>} : memref<64x4xf32, #tpu.memory_space<vmem>>, vector<64x4xf32>,
    %c0_38 = arith.constant 0 : index
    %c0_39 = arith.constant 0 : index
    %40 = vector.load %arg12[%c0_38, %c0_39] : memref<64x4xf32, #tpu.memory_space<vmem>>, vector<64x4xf32>
    %c1_40 = arith.constant 1 : index
    %c0_41 = arith.constant 0 : index
    %c0_42 = arith.constant 0 : index
    %41 = vector.load %arg11[%c1_40, %c0_41, %c0_42] : memref<6x16x12xbf16, #tpu.memory_space<vmem>>, vector<4x16x12xbf16>
    %42 = vector.shape_cast %41 : vector<4x16x12xbf16> to vector<64x12xbf16>
    %c1_43 = arith.constant 1 : index
    %c0_44 = arith.constant 0 : index
    %c0_45 = arith.constant 0 : index
    %43 = vector.load %arg7[%c1_43, %c0_44, %c0_45] : memref<3x12x4xbf16, #tpu.memory_space<vmem>>, vector<1x12x4xbf16>
    %44 = vector.shape_cast %43 : vector<1x12x4xbf16> to vector<12x4xbf16>
    %cst_46 = arith.constant dense<0.000000e+00> : vector<64x4xf32>
    %45 = tpu.matmul %42, %44, %cst_46 {dimension_numbers = #tpu.dot_dimension_numbers<[1], [0], [0], [1], [0, 0, 1, 1], [], []>} : vector<64x12xbf16>, vector<12x4xbf16>, vector<64x4xf32> -> vector<64x4xf32>
    %46 = arith.addf %40, %45 : vector<64x4xf32>
    %c0_47 = arith.constant 0 : index
    %c0_48 = arith.constant 0 : index
    %47 = vector.load %arg12[%c0_47, %c0_48] : memref<64x4xf32, #tpu.memory_space<vmem>>, vector<64x4xf32>
    tpu.vector_store %arg12[%c0_47, %c0_48], %46 {strides = array<i32>} : memref<64x4xf32, #tpu.memory_space<vmem>>, vector<64x4xf32>,
    %c0_49 = arith.constant 0 : index
    %c0_50 = arith.constant 0 : index
    %48 = vector.load %arg12[%c0_49, %c0_50] : memref<64x4xf32, #tpu.memory_space<vmem>>, vector<64x4xf32>
    %c2 = arith.constant 2 : index
    %c0_51 = arith.constant 0 : index
    %c0_52 = arith.constant 0 : index
    %49 = vector.load %arg11[%c2, %c0_51, %c0_52] : memref<6x16x12xbf16, #tpu.memory_space<vmem>>, vector<4x16x12xbf16>
    %50 = vector.shape_cast %49 : vector<4x16x12xbf16> to vector<64x12xbf16>
    %c2_53 = arith.constant 2 : index
    %c0_54 = arith.constant 0 : index
    %c0_55 = arith.constant 0 : index
    %51 = vector.load %arg7[%c2_53, %c0_54, %c0_55] : memref<3x12x4xbf16, #tpu.memory_space<vmem>>, vector<1x12x4xbf16>
    %52 = vector.shape_cast %51 : vector<1x12x4xbf16> to vector<12x4xbf16>
    %cst_56 = arith.constant dense<0.000000e+00> : vector<64x4xf32>
    %53 = tpu.matmul %50, %52, %cst_56 {dimension_numbers = #tpu.dot_dimension_numbers<[1], [0], [0], [1], [0, 0, 1, 1], [], []>} : vector<64x12xbf16>, vector<12x4xbf16>, vector<64x4xf32> -> vector<64x4xf32>
    %54 = arith.addf %48, %53 : vector<64x4xf32>
    %c0_57 = arith.constant 0 : index
    %c0_58 = arith.constant 0 : index
    %55 = vector.load %arg12[%c0_57, %c0_58] : memref<64x4xf32, #tpu.memory_space<vmem>>, vector<64x4xf32>
    tpu.vector_store %arg12[%c0_57, %c0_58], %54 {strides = array<i32>} : memref<64x4xf32, #tpu.memory_space<vmem>>, vector<64x4xf32>,
    %c0_59 = arith.constant 0 : index
    %c0_60 = arith.constant 0 : index
    %56 = vector.load %arg12[%c0_59, %c0_60] : memref<64x4xf32, #tpu.memory_space<vmem>>, vector<64x4xf32>
    %57 = vector.broadcast %1 : vector<1x4xf32> to vector<64x4xf32>
    %58 = arith.addf %56, %57 : vector<64x4xf32>
    %cst_61 = arith.constant 0.000000e+00 : f32
    %59 = vector.broadcast %cst_61 : f32 to vector<64x4xf32>
    %60 = arith.maximumf %58, %59 : vector<64x4xf32>
    %61 = arith.truncf %60 : vector<64x4xf32> to vector<64x4xbf16>
    %c0_62 = arith.constant 0 : index
    %c0_63 = arith.constant 0 : index
    %62 = vector.load %arg8[%c0_62, %c0_63] : memref<4x16xbf16, #tpu.memory_space<vmem>>, vector<4x16xbf16>
    %cst_64 = arith.constant dense<0.000000e+00> : vector<64x16xf32>
    %63 = tpu.matmul %61, %62, %cst_64 {dimension_numbers = #tpu.dot_dimension_numbers<[1], [0], [0], [1], [0, 0, 1, 1], [], []>} : vector<64x4xbf16>, vector<4x16xbf16>, vector<64x16xf32> -> vector<64x16xf32>
    %c0_65 = arith.constant 0 : index
    %c0_66 = arith.constant 0 : index
    %64 = vector.load %arg9[%c0_65, %c0_66] : memref<1x16xf32, #tpu.memory_space<vmem>>, vector<1x16xf32>
    %65 = vector.broadcast %64 : vector<1x16xf32> to vector<64x16xf32>
    %66 = arith.addf %63, %65 : vector<64x16xf32>
    %c0_67 = arith.constant 0 : index
    %c0_68 = arith.constant 0 : index
    %c0_69 = arith.constant 0 : index
    %c0_70 = arith.constant 0 : index
    %67 = vector.load %arg2[%c0_67, %c0_68, %c0_69, %c0_70] : memref<1x4x16x16xbf16, #tpu.memory_space<vmem>>, vector<1x4x16x16xbf16>
    %68 = vector.shape_cast %67 : vector<1x4x16x16xbf16> to vector<4x16x16xbf16>
    %69 = arith.extf %68 : vector<4x16x16xbf16> to vector<4x16x16xf32>
    %70 = vector.shape_cast %69 : vector<4x16x16xf32> to vector<64x16xf32>
    %71 = arith.addf %66, %70 : vector<64x16xf32>
    %cst_71 = arith.constant 0.000000e+00 : f32
    %72 = vector.broadcast %cst_71 : f32 to vector<64x16xf32>
    %73 = arith.maximumf %71, %72 : vector<64x16xf32>
    %74 = vector.shape_cast %73 : vector<64x16xf32> to vector<4x16x16xf32>
    %75 = arith.truncf %74 : vector<4x16x16xf32> to vector<4x16x16xbf16>
    %c0_72 = arith.constant 0 : index
    %c0_73 = arith.constant 0 : index
    %c0_74 = arith.constant 0 : index
    %c0_75 = arith.constant 0 : index
    %76 = vector.load %arg10[%c0_72, %c0_73, %c0_74, %c0_75] : memref<1x4x16x16xbf16, #tpu.memory_space<vmem>>, vector<1x4x16x16xbf16>
    %77 = vector.shape_cast %76 : vector<1x4x16x16xbf16> to vector<4x16x16xbf16>
    %78 = vector.shape_cast %75 : vector<4x16x16xbf16> to vector<1x4x16x16xbf16>
    tpu.vector_store %arg10[%c0_72, %c0_73, %c0_74, %c0_75], %78 {strides = array<i32>} : memref<1x4x16x16xbf16, #tpu.memory_space<vmem>>, vector<1x4x16x16xbf16>,
    return
  }
  func.func @transform_0(%arg0: i32, %arg1: i32) -> (i32, i32, i32, i32) {
    %c0_i32 = arith.constant 0 : i32
    %c0_i32_0 = arith.constant 0 : i32
    %c0_i32_1 = arith.constant 0 : i32
    return %arg0, %arg1, %c0_i32, %c0_i32_0 : i32, i32, i32, i32
  }
  func.func @transform_1(%arg0: i32, %arg1: i32) -> (i32, i32, i32, i32) {
    %c4_i32 = arith.constant 4 : i32
    %0 = arith.muli %arg1, %c4_i32 : i32
    %c1_i32 = arith.constant 1 : i32
    %1 = arith.subi %0, %c1_i32 : i32
    %c0_i32 = arith.constant 0 : i32
    %2 = arith.maxsi %1, %c0_i32 : i32
    %c0_i32_0 = arith.constant 0 : i32
    %c0_i32_1 = arith.constant 0 : i32
    %c0_i32_2 = arith.constant 0 : i32
    return %arg0, %2, %c0_i32_0, %c0_i32_1 : i32, i32, i32, i32
  }
  func.func @transform_2(%arg0: i32, %arg1: i32) -> (i32, i32, i32, i32) {
    %c4_i32 = arith.constant 4 : i32
    %0 = arith.muli %arg1, %c4_i32 : i32
    %c4_i32_0 = arith.constant 4 : i32
    %1 = arith.addi %0, %c4_i32_0 : i32
    %c15_i32 = arith.constant 15 : i32
    %2 = arith.minsi %1, %c15_i32 : i32
    %c0_i32 = arith.constant 0 : i32
    %c0_i32_1 = arith.constant 0 : i32
    %c0_i32_2 = arith.constant 0 : i32
    return %arg0, %2, %c0_i32, %c0_i32_1 : i32, i32, i32, i32
  }
  func.func @transform_3(%arg0: i32, %arg1: i32) -> (i32, i32) {
    %c0_i32 = arith.constant 0 : i32
    %c0_i32_0 = arith.constant 0 : i32
    %c0_i32_1 = arith.constant 0 : i32
    return %c0_i32, %c0_i32_0 : i32, i32
  }
  func.func @transform_4(%arg0: i32, %arg1: i32) -> (i32, i32) {
    %c0_i32 = arith.constant 0 : i32
    %c0_i32_0 = arith.constant 0 : i32
    %c0_i32_1 = arith.constant 0 : i32
    return %c0_i32, %c0_i32_0 : i32, i32
  }
  func.func @transform_5(%arg0: i32, %arg1: i32) -> (i32, i32, i32) {
    %c0_i32 = arith.constant 0 : i32
    %c0_i32_0 = arith.constant 0 : i32
    %c0_i32_1 = arith.constant 0 : i32
    %c0_i32_2 = arith.constant 0 : i32
    return %c0_i32, %c0_i32_0, %c0_i32_1 : i32, i32, i32
  }
  func.func @transform_6(%arg0: i32, %arg1: i32) -> (i32, i32) {
    %c0_i32 = arith.constant 0 : i32
    %c0_i32_0 = arith.constant 0 : i32
    %c0_i32_1 = arith.constant 0 : i32
    return %c0_i32, %c0_i32_0 : i32, i32
  }
  func.func @transform_7(%arg0: i32, %arg1: i32) -> (i32, i32) {
    %c0_i32 = arith.constant 0 : i32
    %c0_i32_0 = arith.constant 0 : i32
    %c0_i32_1 = arith.constant 0 : i32
    return %c0_i32, %c0_i32_0 : i32, i32
  }
  func.func @transform_8(%arg0: i32, %arg1: i32) -> (i32, i32, i32, i32) {
    %c0_i32 = arith.constant 0 : i32
    %c0_i32_0 = arith.constant 0 : i32
    %c0_i32_1 = arith.constant 0 : i32
    return %arg0, %arg1, %c0_i32, %c0_i32_0 : i32, i32, i32, i32
  }
}

</mosaic_0001>

<bundles_post_ra>
// kernel: tpu_custom_call.1
= control target key start
LH: loop header
LB: loop body
LE: loop exit
PB: predicated region body
PF: predicated region fallthrough
CT: control target
= control target key end

     0   :  { %s2978_s0 = inlined_call_operand.hbm [shape: bf16[2,16,16,16], index: 0, kind: input, shape index: {}]   ;;  %s2979_s1 = inlined_call_operand.hbm [shape: bf16[2,16,16,16], index: 1, kind: input, shape index: {}]   ;;  %s2980_s2 = inlined_call_operand.hbm [shape: bf16[2,16,16,16], index: 2, kind: input, shape index: {}]   ;;  %s2981_s3 = inlined_call_operand.vmem [shape: bf16[16,4], index: 3, kind: input, shape index: {}]   ;;  %s2982_s4 = inlined_call_operand.vmem [shape: f32[2,4], index: 4, kind: input, shape index: {}]   ;;  %s2983_s5 = inlined_call_operand.vmem [shape: bf16[3,12,4], index: 5, kind: input, shape index: {}]   ;;  %s2984_s6 = inlined_call_operand.vmem [shape: bf16[4,16], index: 6, kind: input, shape index: {}]   ;;  %s2985_s7 = inlined_call_operand.vmem [shape: f32[1,16], index: 7, kind: input, shape index: {}]   ;;  %s2986_s8 = inlined_call_operand.hbm [shape: bf16[2,16,16,16], index: 8, kind: output, shape index: {}]  }
   0x1   :  { %3011 = sst [smem:[#allocation27_spill]] %s2978_s0 }
   0x2   :  { %3012 = sst [smem:[#allocation28_spill]] %s2979_s1 }
   0x3   :  { %3013 = sst [smem:[#allocation29_spill]] %s2980_s2 }
   0x4   :  { %3014 = sst [smem:[#allocation30_spill]] %s2981_s3 }
   0x5   :  { %3015 = sst [smem:[#allocation31_spill]] %s2982_s4 }
   0x6   :  { %3016 = sst [smem:[#allocation32_spill]] %s2983_s5 }
   0x7   :  { %3017 = sst [smem:[#allocation33_spill]] %s2984_s6 }
   0x8   :  { %3018 = sst [smem:[#allocation34_spill]] %s2985_s7 }
   0x9   :  { %3019 = sst [smem:[#allocation35_spill]] %s2986_s8 }
   0xa   :  { %13 = vsyncpa [#allocation5], 0 }
   0xb   :  { %15 = vsyncpa [#allocation5 + $0x1], 0 }
   0xc   :  { %16 = vsyncpa [#allocation8], 0 }
   0xd   :  { %18 = vsyncpa [#allocation8 + $0x1], 0 }
   0xe   :  { %19 = vsyncpa [#allocation6], 0 }
   0xf   :  { %21 = vsyncpa [#allocation6 + $0x1], 0  ;;  %s2310_s27 = smov 0   ;;  %s2312_s28 = smov 0  }
  0x10   :  { %s2314_s29 = smov 0   ;;  %s2316_s30 = smov 0  }
  0x11   :  { %s2318_s9 = smov 0   ;;  %s2320_s10 = smov 0  }
  0x12   :  { %s2322_s11 = smov 0   ;;  %s2324_s12 = smov 0  }
  0x13   :  { %s2326_s13 = smov 0   ;;  %s2328_s14 = smov 0  }
  0x14   :  { %s2330_s15 = smov 0   ;;  %s2332_s16 = smov 0  }
  0x15   :  { %s2334_s17 = smov 0   ;;  %s2336_s18 = smov 0  }
  0x16 LB: > { %3020 = sst [smem:[#allocation15_spill]] %s2208_s9  ;;  %s2381_s19 = sadd.s32 4294967295, %s2244_s18   ;;  %s2244_s18 = sphi %s2336_s18, %s27_s18   ;;  %s2240_s17 = sphi %s2334_s17, %s3100_s17   ;;  %s2236_s16 = sphi %s2332_s16, %s3099_s16   ;;  %s2232_s15 = sphi %s2330_s15, %s3109_s15   ;;  %s2228_s14 = sphi %s2328_s14, %s3097_s14   ;;  %s2224_s13 = sphi %s2326_s13, %s3096_s13   ;;  %s2220_s12 = sphi %s2324_s12, %s3108_s12   ;;  %s2216_s11 = sphi %s2322_s11, %s3107_s11   ;;  %s2212_s10 = sphi %s2320_s10, %s3106_s10   ;;  %s2208_s9 = sphi %s2318_s9, %s3105_s9   ;;  %s2204_s30 = sphi %s2316_s30, %s3093_s30   ;;  %s2200_s29 = sphi %s2314_s29, %s3104_s29   ;;  %s2196_s28 = sphi %s2312_s28, %s3103_s28   ;;  %s2192_s27 = sphi %s2310_s27, %s3102_s27  }
  0x17   : > { %3021 = sst [smem:[#allocation16_spill]] %s2224_s13  ;;  %s36_s20 = sadd.s32 1, %s2236_s16 }
  0x18   : > { %3022 = sst [smem:[#allocation17_spill]] %s2228_s14  ;;  %p37_p0 = scmp.ge.s32.totalorder %s36_s20, 4 }
  0x19   : > { %3023 = sst [smem:[#allocation18_spill]] %s2232_s15  ;;  %s39_s21 = sadd.s32 1, %s2240_s17 }
  0x1a   : > { %3024 = sst [smem:[#allocation19_spill]] %s2236_s16  ;;  %p2999_p1 = scmp.eq.s32.totalorder %s2244_s18, 0 }
  0x1b   : > { %3025 = sst [smem:[#allocation20_spill]] %s2240_s17  ;;  %p2998_p2 = scmp.eq.s32.totalorder %s2381_s19, 0 }
  0x1c   : > { %s3111_s20 = smov (%p37_p0, %s36_s20), 0  ;;  %s3113_s21 = smov (!%p37_p0, %s39_s21), %s2240_s17 }
  0x1d   : > { %3026 = sst [smem:[#allocation21_spill]] %s3111_s20  ;;  %s44_s22 = ssub.s32 %s2236_s16, %s3111_s20 }
  0x1e   : > { %s1622_s23 = sshll.u32 %s2236_s16, 2  ;;  %p41_p3 = scmp.ge.s32.totalorder %s3113_s21, 2 }
  0x1f   : > { %s1623_s24 = sadd.s32 4294967295, %s1622_s23  ;;  %s1624_s25 = sshll.u32 %s3111_s20, 2 }
  0x20   : > { %p73_p4 = scmp.gt.s32.totalorder %s1623_s24, 0  ;;  %s3115_s21 = smov (%p41_p3, %s3113_s21), 0 }
  0x21   : > { %3027 = sst [smem:[#allocation22_spill]] %s3115_s21  ;;  %s2398_s26 = ssub.s32 %s2240_s17, %s3115_s21 }
  0x22   : > { %s3117_s24 = smov (!%p73_p4, %s1623_s24), 0  ;;  %3028 = sst [smem:[#allocation23_spill]] %s2398_s26 }
  0x23   : > { %s1625_s8 = sadd.s32 4294967295, %s1624_s25  ;;  %s2401_s15 = sor.u32 %s44_s22, %s2398_s26 }
  0x24   : > { %p77_p5 = scmp.gt.s32.totalorder %s1625_s8, 0  ;;  %s84_s7 = sadd.s32 1, %s2212_s10 }
  0x25   : > { %p91_p7 = scmp.ne.s32.totalorder %s2212_s10, %s2208_s9  ;;  %p97_p8 = scmp.ne.s32.totalorder %s2208_s9, %s2204_s30 }
  0x26   : > { %s3119_s8 = smov (!%p77_p5, %s1625_s8), 0  ;;  %s2409_s21 = sadd.s32 4, %s1622_s23 }
  0x27   : > { %s80_s20 = ssub.s32 %s3117_s24, %s3119_s8  ;;  %p2414_p9 = por %p91_p7, %p2999_p1 }
  0x28   : > { %s81_s6 = sor.u32 %s80_s20, %s2398_s26  ;;  %p2420_p11 = por %p97_p8, %p2998_p2 }
  0x29   : > { %p82_p10 = scmp.eq.s32.totalorder %s81_s6, 0  ;;  %s2425_s30 = sadd.s32 4, %s1624_s25 }
  0x2a   : > { %s3030_s5 = scalar_select %p2420_p11, 1, 0 }
  0x2b   : > { %s2428_s8 = scalar_select %p82_p10, %s2212_s10, %s84_s7  }
  0x2c   : > { %3031 = sst [smem:[#allocation24_spill]] %s3030_s5  ;;  %p2997_p0 = scmp.lt.s32.totalorder %s2244_s18, 8 }
  0x2d   : > { %3032 = sst [smem:[#allocation25_spill]] %s2428_s8  ;;  %s2433_s20 = sshll.u32 %s2240_s17, 5 }
  0x2e   : > { %s329_s6 = sand.u32 1, %s2244_s18   ;;  %s331_s23 = sand.u32 1, %s2212_s10  }
  0x2f   : > { %s1635_s14 = sshll.u32 %s331_s23, 3  ;;  %s1638_s3 = sshll.u32 %s3117_s24, 1 }
  0x30   : > { %s343_s4 = sadd.s32 %s1638_s3, %s2433_s20  ;;  %s333_s5 = scalar_lea.vmem [#allocation7], %s1635_s14 }
  0x31   : > { %s346_s9 = sshll.u32 %s333_s5, 4  ;;  %s1640_s2 = sshll.u32 %s343_s4, 6  ;;  %s2438_s9 = int_to_ptr.vmem [resolvable:$true] %s346_s9 }
  0x32   : > { %s3033_s1 = sld [smem:[#allocation28_spill]]  ;;  %p2449_p3 = pnand %p2997_p0, %p2414_p9 }
  0x33   : > { %s2455_s3 = scalar_lea.sflag [#allocation8], %s329_s6 }
  0x34   : > { %p2002_p8 = pneg %p2449_p3 }
  0x38   : > { %s2443_s7 = scalar_lea.hbm %s3033_s1, %s1640_s2  ;;  %s2005_s14 = scalar_lea.hbm %s3033_s1, 4096 }
  0x39   : > { %s2000_s4 = scalar_lea.hbm %s2443_s7, 128  ;;  %p2006_p9 = scmp.lt.u32.totalorder %s2443_s7, %s3033_s1 }
  0x3a   : > { %p2001_p7 = scmp.ne.s32.totalorder %s2443_s7, %s2000_s4  ;;  %p2007_p12 = scmp.lt.u32.totalorder %s2005_s14, %s2000_s4 }
  0x3b   : > { %p2009_p2 = scmp.lt.u32.totalorder %s2000_s4, %s2443_s7 }
  0x3c   : > { %p2003_p10 = pnand %p2002_p8, %p2001_p7  ;;  %p2008_p0 = por %p2007_p12, %p2006_p9 }
  0x3e   : > { %p2004_p13 = pneg %p2003_p10  ;;  %p2010_p1 = por %p2009_p2, %p2008_p0 }
  0x40   : > { %p2011_p6 = pnand %p2010_p1, %p2004_p13 }
  0x42   : > { %2014 = shalt.err (!%p2011_p6)
}
  0x43   : > { %s2015_s22 = scalar_lea.vmem %s2438_s9, 128  ;;  %s2246_s6 = smov [#allocation7]  }
  0x44   : > { %p2016_p7 = scmp.ne.s32.totalorder %s2438_s9, %s2015_s22  ;;  %s2020_s25 = sshll.u32 %s2246_s6, 4  ;;  %s2021_s25 = int_to_ptr.vmem [resolvable:$false] %s2020_s25 }
  0x45   : > { %s2022_s2 = scalar_lea.vmem %s2021_s25, 256  ;;  %p2023_p5 = scmp.lt.s32.totalorder %s2438_s9, %s2021_s25 }
  0x46   : > { %p2018_p10 = pnand %p2016_p7, %p2002_p8  ;;  %p2024_p12 = scmp.lt.s32.totalorder %s2022_s2, %s2015_s22 }
  0x48   : > { %p2019_p4 = pneg %p2018_p10  ;;  %p2025_p9 = por %p2024_p12, %p2023_p5 }
  0x4a   : > { %p2026_p2 = pnand %p2025_p9, %p2019_p4 }
  0x4c   : > { %2029 = shalt.err (!%p2026_p2)
}
  0x4d   : > { %s3000_s4 = smov 64   ;;  %s3002_s5 = smov 4  }
  0x4e   : > { %1851 = dma.hbm_to_vmem [thread:$0]  (!%p2449_p3), %s2443_s7, 128, %s2438_s9, %s2455_s3, %s3000_s4, %s3000_s4, %s3002_s5  }
  0x4f   : > { %p3035_p1 = scmp.lt.s32.totalorder %s2244_s18, 9  ;;  %p3036_p6 = scmp.ge.s32.totalorder %s2244_s18, 1 }
  0x50   : > { %s1621_s24 = sadd.s32 4294967294, %s2244_s18   ;;  %s48_s26 = sadd.s32 1, %s2224_s13 }
  0x51   : > { %p2490_p13 = pnand %p3036_p6, %p3035_p1  ;;  %p3038_p0 = scmp.eq.s32.totalorder %s2401_s15, 0 }
  0x52   : > { %p55_p4 = scmp.ne.s32.totalorder %s2224_s13, %s2220_s12  ;;  %p61_p5 = scmp.ne.s32.totalorder %s2220_s12, %s2216_s11 }
  0x53   : > { %s2499_s22 = scalar_select %p3038_p0, %s2224_s13, %s48_s26  }
  0x54   : > { %p264_p8 = scmp.eq.s32.totalorder %s2381_s19, 7  ;;  %p270_p7 = scmp.eq.s32.totalorder %s1621_s24, 7 }
  0x55   : > { %3039 = sst [smem:[#allocation26_spill]] %s2499_s22  ;;  %p3040_p10 = scmp.eq.s32.totalorder %s2244_s18, 0 }
  0x56   : > { %p3042_p3 = scmp.eq.s32.totalorder %s2381_s19, 0  ;;  %p2518_p2 = por %p264_p8, %p55_p4 }
  0x57   : > { %p2508_p12 = por %p3040_p10, %p55_p4  ;;  %p2522_p1 = por %p270_p7, %p61_p5 }
  0x58   : > { %p2514_p9 = por %p3042_p3, %p61_p5  ;;  %s305_s6 = sand.u32 1, %s2224_s13  }
  0x59   : > { %s3044_s15 = scalar_select %p2518_p2, 1, 0 }
  0x5a   : > { %s3043_s7 = scalar_select %p2514_p9, 1, 0 }
  0x5b   : > { %s3045_s23 = scalar_select %p2522_p1, 1, 0 }
  0x5c   : > { %s1711_s25 = sshll.u32 %s2236_s16, 3  ;;  %s1630_s2 = sshll.u32 %s305_s6, 5 }
  0x5d   : > { %s316_s24 = sadd.s32 %s1711_s25, %s2433_s20  ;;  %s309_s4 = scalar_lea.vmem [#allocation4], %s1630_s2 }
  0x5e   : > { %s1634_s26 = sshll.u32 %s316_s24, 6  ;;  %s319_s5 = sshll.u32 %s309_s4, 4  ;;  %s2534_s5 = int_to_ptr.vmem [resolvable:$true] %s319_s5 }
  0x5f   : > { %s3046_s0 = sld [smem:[#allocation27_spill]]  ;;  %p3047_p6 = scmp.lt.s32.totalorder %s2244_s18, 8 }
  0x60   : > { %s2544_s4 = scalar_lea.sflag [#allocation5], %s305_s6 }
  0x61   : > { %p2540_p0 = pnand %p3047_p6, %p2508_p12 }
  0x63   : > { %p2032_p5 = pneg %p2540_p0 }
  0x65   : > { %s2532_s22 = scalar_lea.hbm %s3046_s0, %s1634_s26  ;;  %s2035_s9 = scalar_lea.hbm %s3046_s0, 4096 }
  0x66   : > { %s2030_s25 = scalar_lea.hbm %s2532_s22, 512  ;;  %p2036_p10 = scmp.lt.u32.totalorder %s2532_s22, %s3046_s0 }
  0x67   : > { %p2031_p4 = scmp.ne.s32.totalorder %s2532_s22, %s2030_s25  ;;  %p2037_p12 = scmp.lt.u32.totalorder %s2035_s9, %s2030_s25 }
  0x68   : > { %p2039_p6 = scmp.lt.u32.totalorder %s2030_s25, %s2532_s22 }
  0x69   : > { %p2033_p8 = pnand %p2032_p5, %p2031_p4  ;;  %p2038_p3 = por %p2037_p12, %p2036_p10 }
  0x6b   : > { %p2034_p7 = pneg %p2033_p8  ;;  %p2040_p1 = por %p2039_p6, %p2038_p3 }
  0x6d   : > { %p2041_p2 = pnand %p2040_p1, %p2034_p7 }
  0x6f   : > { %2044 = shalt.err (!%p2041_p2)
}
  0x70   : > { %s2045_s6 = scalar_lea.vmem %s2534_s5, 512  ;;  %s2249_s26 = smov [#allocation4]  }
  0x71   : > { %p2046_p4 = scmp.ne.s32.totalorder %s2534_s5, %s2045_s6  ;;  %s2050_s1 = sshll.u32 %s2249_s26, 4  ;;  %s2051_s1 = int_to_ptr.vmem [resolvable:$false] %s2050_s1 }
  0x72   : > { %s2052_s17 = scalar_lea.vmem %s2051_s1, 1024  ;;  %p2053_p9 = scmp.lt.s32.totalorder %s2534_s5, %s2051_s1 }
  0x73   : > { %p2048_p8 = pnand %p2046_p4, %p2032_p5  ;;  %p2054_p10 = scmp.lt.s32.totalorder %s2052_s17, %s2045_s6 }
  0x75   : > { %p2049_p11 = pneg %p2048_p8  ;;  %p2055_p12 = por %p2054_p10, %p2053_p9 }
  0x77   : > { %p2056_p3 = pnand %p2055_p12, %p2049_p11 }
  0x79   : > { %2059 = shalt.err (!%p2056_p3)
}
  0x7a   : > { %s3049_s25 = smov 4   ;;  %s3050_s9 = smov 64  }
  0x7b   : > { %s3051_s2 = sld [smem:[#allocation23_spill]]  ;;  %p3052_p11 = scmp.lt.s32.totalorder %s2409_s21, 15 }
  0x7c   : > { %1848 = dma.hbm_to_vmem [thread:$0]  (!%p2540_p0), %s2532_s22, 512, %s2534_s5, %s2544_s4, %s3050_s9, %s3050_s9, %s3049_s25  }
  0x7d   : > { %s3121_s21 = smov (!%p3052_p11, %s2409_s21), 15  ;;  %p3053_p9 = scmp.lt.s32.totalorder %s2425_s30, 15 }
  0x7e   : > { %s120_s16 = sadd.s32 1, %s2200_s29  ;;  %p127_p2 = scmp.ne.s32.totalorder %s2200_s29, %s2196_s28 }
  0x7f   : > { %s3123_s30 = smov (!%p3053_p9, %s2425_s30), 15  ;;  %p133_p1 = scmp.ne.s32.totalorder %s2196_s28, %s2192_s27 }
  0x80   : > { %s116_s24 = ssub.s32 %s3121_s21, %s3123_s30  ;;  %p3054_p5 = scmp.eq.s32.totalorder %s2244_s18, 0 }
  0x81   : > { %s117_s6 = sor.u32 %s116_s24, %s3051_s2  ;;  %p3056_p4 = scmp.eq.s32.totalorder %s2381_s19, 0 }
  0x82   : > { %p2589_p7 = por %p127_p2, %p3054_p5  ;;  %p118_p6 = scmp.eq.s32.totalorder %s117_s6, 0 }
  0x83   : > { %p2595_p8 = por %p133_p1, %p3056_p4  ;;  %s358_s22 = sand.u32 1, %s2200_s29  }
  0x84   : > { %s1643_s4 = sshll.u32 %s3121_s21, 1  ;;  %s1641_s30 = sshll.u32 %s358_s22, 3 }
  0x85   : > { %s3057_s5 = scalar_select %p2595_p8, 1, 0 }
  0x86   : > { %s2601_s1 = scalar_select %p118_p6, %s2200_s29, %s120_s16  }
  0x87   : > { %s370_s17 = sadd.s32 %s1643_s4, %s2433_s20  ;;  %s3058_s0 = sld [smem:[#allocation29_spill]] }
  0x88   : > { %s1645_s27 = sshll.u32 %s370_s17, 6  ;;  %s360_s6 = scalar_lea.vmem [#allocation9], %s1641_s30 }
  0x89   : > { %s373_s8 = sshll.u32 %s360_s6, 4  ;;  %p3059_p0 = scmp.lt.s32.totalorder %s2244_s18, 8  ;;  %s2609_s8 = int_to_ptr.vmem [resolvable:$true] %s373_s8 }
  0x8b   : > { %p2615_p10 = pnand %p3059_p0, %p2589_p7 }
  0x8d   : > { %s2607_s13 = scalar_lea.hbm %s3058_s0, %s1645_s27  ;;  %p2062_p3 = pneg %p2615_p10 }
  0x8e   : > { %s2060_s20 = scalar_lea.hbm %s2607_s13, 128  ;;  %s2065_s4 = scalar_lea.hbm %s3058_s0, 4096 }
  0x8f   : > { %p2061_p12 = scmp.ne.s32.totalorder %s2607_s13, %s2060_s20  ;;  %p2066_p2 = scmp.lt.u32.totalorder %s2607_s13, %s3058_s0 }
  0x90   : > { %p2067_p1 = scmp.lt.u32.totalorder %s2065_s4, %s2060_s20  ;;  %p2069_p7 = scmp.lt.u32.totalorder %s2060_s20, %s2607_s13 }
  0x91   : > { %p2063_p11 = pnand %p2062_p3, %p2061_p12 }
  0x92   : > { %p2068_p5 = por %p2067_p1, %p2066_p2 }
  0x93   : > { %p2064_p9 = pneg %p2063_p11 }
  0x94   : > { %p2070_p6 = por %p2069_p7, %p2068_p5 }
  0x96   : > { %p2071_p4 = pnand %p2070_p6, %p2064_p9 }
  0x98   : > { %2074 = shalt.err (!%p2071_p4)
}
  0x99   : > { %s2075_s17 = scalar_lea.vmem %s2609_s8, 128  ;;  %s2250_s27 = smov [#allocation9]  }
  0x9a   : > { %p2076_p0 = scmp.ne.s32.totalorder %s2609_s8, %s2075_s17  ;;  %s2080_s2 = sshll.u32 %s2250_s27, 4  ;;  %s2081_s2 = int_to_ptr.vmem [resolvable:$false] %s2080_s2 }
  0x9b   : > { %s2082_s24 = scalar_lea.vmem %s2081_s2, 256  ;;  %p2083_p8 = scmp.lt.s32.totalorder %s2609_s8, %s2081_s2 }
  0x9c   : > { %p2078_p12 = pnand %p2076_p0, %p2062_p3  ;;  %p2084_p2 = scmp.lt.s32.totalorder %s2082_s24, %s2075_s17 }
  0x9e   : > { %p2079_p11 = pneg %p2078_p12  ;;  %p2085_p1 = por %p2084_p2, %p2083_p8 }
  0xa0   : > { %p2086_p5 = pnand %p2085_p1, %p2079_p11 }
  0xa2   : > { %2089 = shalt.err (!%p2086_p5)
}
  0xa3   : > { %1854 = dma.hbm_to_vmem [thread:$0]  (!%p2615_p10), %s2607_s13, 128, %s2609_s8, %s2455_s3, %s3050_s9, %s3050_s9, %s3049_s25  }
  0xa4   : > { %385 = sbr.rel (%p2490_p13) target bundleno = 1726 (0x6be), region = 52  ;;  %s2651_s6 = sand.u32 (!%p2490_p13), 1, %s2220_s12  }
  0xa5   : > { %s1647_s20 = sshll.u32 (!%p2490_p13), %s2651_s6, 5  ;;  %s388_s16 = scalar_lea.sflag (!%p2490_p13), [#allocation5], %s2651_s6 }
  0xa6   : > { %s2657_s21 = scalar_lea.vmem (!%p2490_p13), [#allocation4], %s1647_s20  ;;  %p3061_p8 = scmp.ne.s32.totalorder (!%p2490_p13), %s3043_s7, 0 }
  0xab   : > { %2175 = dma.done.wait (%p3061_p8), %s388_s16, 512  }
  0xac   : > { %2177 = vsyncadd (%p3061_p8), %s388_s16, 4294966784  ;;  %s3062_s13 = sld [smem:[#allocation15_spill]]  ;;  %s3063_s8 = sld [smem:[#allocation24_spill]] }
  0xad   : > { %s396_s3 = sand.u32 1, %s2381_s19  }
  0xae   : > { %s397_s9 = scalar_lea.sflag [#allocation8], %s396_s3 }
  0xb2   : > { %s398_s14 = sand.u32 1, %s3062_s13   ;;  %p3064_p13 = scmp.ne.s32.totalorder %s3063_s8, 0 }
  0xb3   : > { %s2665_s25 = sshll.u32 %s398_s14, 3 }
  0xb4   : > { %s400_s22 = scalar_lea.vmem [#allocation7], %s2665_s25 }
  0xb5   : > { %2179 = dma.done.wait (%p3064_p13), %s397_s9, 128  }
  0xb6   : > { %2181 = vsyncadd (%p3064_p13), %s397_s9, 4294967168  ;;  %s407_s4 = sand.u32 1, %s2196_s28   ;;  %p3065_p10 = scmp.ne.s32.totalorder %s3057_s5, 0 }
  0xb7   : > { %s2673_s7 = sshll.u32 %s407_s4, 3 }
  0xb8   : > { %s409_s26 = scalar_lea.vmem [#allocation9], %s2673_s7 }
  0xb9   : > { %2183 = dma.done.wait (%p3065_p10), %s397_s9, 128  }
  0xba   : > { %2185 = vsyncadd (%p3065_p10), %s397_s9, 4294967168  ;;  %s3066_s17 = sld [smem:[#allocation31_spill]]  ;;  %s3068_s16 = sld [smem:[#allocation30_spill]]  ;;  %v1989_v2 = vld [vmem:[%s2657_s21] sm:$0xff]   ;;  %vm505_vm0 = vcmask 130048   ;;  %v1990_v3 = vld [vmem:[%s2657_s21 + $0x10] sm:$0xff]  }
  0xbb   : > { %v1991_v4 = vld [vmem:[%s2657_s21 + $0x8] sm:$0xff]   ;;  %1771 = vmatprep.mubr.msk.bf16.mxu0 %vm505_vm0, %v1989_v2  ;;  %1775 = vmatprep.mubr.msk.bf16.mxu1 %vm505_vm0, %v1990_v3  ;;  %v1992_v5 = vld [vmem:[%s2657_s21 + $0x18] sm:$0xff]   ;;  %s2251_s8 = smov 4   ;;  %s2252_s3 = smov 8   ;;  %vm612_vm1 = vcmask 64544   ;;  %vm649_vm2 = vcmask 31744  }
  0xbc   : > { %vm650_vm3 = vsmask.f32 7938  ;;  %vm664_vm5 = vcmask 24576   ;;  %vm665_vm6 = vsmask.f32 256  ;;  %vm699_vm8 = vcmask 97344  }
  0xbd   : > { %vm2718_vm4 = vmand %vm649_vm2, %vm650_vm3  ;;  %vm700_vm9 = vsmask.f32 7424  ;;  %vm714_vm11 = vcmask 97351   ;;  %vm715_vm12 = vsmask.f32 7966  ;;  %s2768_s14 = scalar_lea.vmem [#allocation10], %s1647_s20 }
  0xbe   : > { %vm2730_vm7 = vmand %vm664_vm5, %vm665_vm6  ;;  %s3077_s9 = sld [smem:[#allocation17_spill]] }
  0xbf   : > { %vm2742_vm10 = vmand %vm699_vm8, %vm700_vm9 }
  0xc0   : > { %s3067_s2 = smov %s3066_s17  ;;  %v2683_v0 = vld [vmem:[%s3066_s17 + $0x1] ss:$0 sm:$0xff]  ;;  %vm2754_vm13 = vmand %vm714_vm11, %vm715_vm12 }
  0xc1   : > { %v1988_v1 = vld [vmem:[%s3068_s16] sm:$0xff]  }
  0xc2   : > { %1769 = vmatprep.subr.bf16.mxu0 %v1988_v1  ;;  %1831 = vmatprep.subr.bf16.mxu1 %v1988_v1  ;;  %v2699_v6 = vld [vmem:[%s3067_s2] ss:$0 sm:$0xff] }
  0xc3   : > { %1770 = vmatpush3.bf16.msra.mxu0 %v1988_v1  ;;  %1832 = vmatpush3.bf16.msra.mxu1 %v1988_v1 }
  0xc4   : > { %p1661_p3 = scmp.le.s32.totalorder %s3077_s9, 0 }
  0xc5   : > { %s3078_s30 = sld [smem:[#allocation30_spill]] (!%p1661_p3)  ;;  %vm2254_vm14 = vmmov (!%p1661_p3), 0   ;;  %s2255_s20 = smov (!%p1661_p3), 4  }
  0xc6   : > { %1772 = vmatmul.mubr.msk.bf16.vlgmr.msra.gmra.mrb[0].mxu0 %vm505_vm0, %v1991_v4  ;;  %1776 = vmatmul.mubr.msk.bf16.vlgmr.msra.gmra.mrb[0].mxu1 %vm505_vm0, %v1992_v5  ;;  %s2256_s25 = smov (!%p1661_p3), 8  }
 0x199   : > { %v1773_v7 = vpop.f32.mrb[0].mxu0  ;;  %v1777_v8 = vpop.f32.mrb[0].mxu1 }
 0x19a   : > { %v561_v9 = vadd.f32 %v1773_v7, %v2699_v6  ;;  %v577_v10 = vadd.f32 %v1777_v8, %v2699_v6  ;;  %v552_v11 = vpop.f32.mrb[1].mxu0  ;;  %v568_v12 = vpop.f32.mrb[1].mxu1 }
 0x19b   : > { %v553_v13 = vadd.f32 %v2699_v6, %v552_v11  ;;  %v569_v14 = vadd.f32 %v2699_v6, %v568_v12  ;;  %v1774_v15 = vpop.f32.mrb[2].mxu0  ;;  %v1778_v16 = vpop.f32.mrb[2].mxu1 }
 0x19c   : > { %v564_v17 = vadd.f32 %v1774_v15, %v2699_v6  ;;  %v580_v18 = vadd.f32 %v1778_v16, %v2699_v6  ;;  %v555_v19 = vpop.f32.mrb[3].mxu0  ;;  %v571_v20 = vpop.f32.mrb[3].mxu1  ;;  %v585_v23 = vmax.f32 %v561_v9, 0.0  ;;  %v589_v24 = vmax.f32 %v577_v10, 0.0 }
 0x19d   : > { %v556_v21 = vadd.f32 %v2699_v6, %v555_v19  ;;  %v572_v22 = vadd.f32 %v2699_v6, %v571_v20  ;;  %v583_v27 = vmax.f32 %v553_v13, 0.0  ;;  %v587_v28 = vmax.f32 %v569_v14, 0.0 }
 0x19e   : > { %v586_v25 = vmax.f32 %v564_v17, 0.0  ;;  %v590_v26 = vmax.f32 %v580_v18, 0.0 }
 0x19f   : > { %v584_v29 = vmax.f32 %v556_v21, 0.0  ;;  %v588_v30 = vmax.f32 %v572_v22, 0.0 }
 0x1a0   : > { %v592_v31 = vpack.c.bf16 %v586_v25, %v585_v23  ;;  %v594_v32 = vpack.c.bf16 %v590_v26, %v589_v24 }
 0x1a1   : > { %v591_v33 = vpack.c.bf16 %v584_v29, %v583_v27  ;;  %v593_v34 = vpack.c.bf16 %v588_v30, %v587_v28 }
 0x1a2   : > { %v628_v35 = vshll.u32 %v592_v31, 16  ;;  %v625_v36 = vshrl.u32 %v592_v31, 16  ;;  %v639_v37 = vshrl.u32 %v594_v32, 16  ;;  %v642_v41 = vshll.u32 %v594_v32, 16 }
 0x1a3   : > { %v621_v38 = vshll.u32 %v591_v33, 16  ;;  %603 = vrot.lane.b32.xlu1 %v593_v34, %s2251_s8  ;;  %599 = vrot.lane.b32.xlu0 %v591_v33, %s2251_s8  ;;  %v618_v39 = vshrl.u32 %v591_v33, 16  ;;  %v632_v40 = vshrl.u32 %v593_v34, 16  ;;  %v635_v42 = vshll.u32 %v593_v34, 16 }
 0x1a4   : > { %v627_v43 = vrot.slane %v625_v36, 7  ;;  %v641_v44 = vrot.slane %v639_v37, 7  ;;  %v681_v45 = vrot.slane %v628_v35, 1  ;;  %v685_v55 = vrot.slane %v642_v41, 1 }
 0x1a5   : > { %v679_v46 = vrot.slane %v621_v38, 1  ;;  %v620_v47 = vrot.slane %v618_v39, 7  ;;  %v634_v48 = vrot.slane %v632_v40, 7  ;;  %v683_v56 = vrot.slane %v635_v42, 1 }
 0x1a6   : > { %v630_v49 = vor.u32 %v628_v35, %v627_v43  ;;  %v644_v50 = vor.u32 %v642_v41, %v641_v44  ;;  %v682_v53 = vor.u32 %v681_v45, %v625_v36  ;;  %v686_v57 = vor.u32 %v685_v55, %v639_v37  ;;  %v1993_v41 = vld [vmem:[%s3078_s30] sm:$0xff] (!%p1661_p3)   ;;  %v1994_v43 = vld [vmem:[%s400_s22] sm:$0xff] (!%p1661_p3)  }
 0x1a7   : > { %605 = vrot.lane.b32.xlu1 %v594_v32, %s2251_s8  ;;  %601 = vrot.lane.b32.xlu0 %v592_v31, %s2251_s8  ;;  %v623_v51 = vor.u32 %v621_v38, %v620_v47  ;;  %v637_v52 = vor.u32 %v635_v42, %v634_v48  ;;  %v680_v54 = vor.u32 %v679_v46, %v618_v39  ;;  %v2253_v42 = vmov (!%p1661_p3), 0.0  }
 0x1a8   : > { %v684_v58 = vor.u32 %v683_v56, %v632_v40  ;;  %1779 = vmatprep.subr.bf16.mxu0 (!%p1661_p3), %v2253_v42  ;;  %1781 = vmatprep.mubr.msk.bf16.mxu0 (!%p1661_p3), %vm2254_vm14, %v2253_v42 }
 0x1a9   : > { %1780 = vmatpush3.bf16.msra.mxu0 (!%p1661_p3), %v1993_v41 }
 0x1ab   : > { %689 = vrot.lane.b32.xlu1 %v682_v53, %s2252_s3  ;;  %687 = vrot.lane.b32.xlu0 %v680_v54, %s2252_s3 }
 0x1ac   : > { %1782 = vmatmul.mubr.msk.bf16.vlgmr.msra.gmra.mrb[0].mxu0 (!%p1661_p3), %vm505_vm0, %v1994_v43 }
 0x1af   : > { %693 = vrot.lane.b32.xlu1 %v686_v57, %s2252_s3  ;;  %691 = vrot.lane.b32.xlu0 %v684_v58, %s2252_s3 }
 0x215   : > { %v604_v59 = vpop.permute.xlu1 %603  ;;  %v600_v60 = vpop.permute.xlu0 %599 }
 0x216   : > { %615 = vst.msk [vmem:[#allocation2 + $0x18] sm:$0xff] %vm612_vm1, %v604_v59  ;;  %613 = vst.msk [vmem:[#allocation2 + $0x8] sm:$0xff] %vm612_vm1, %v600_v60 }
 0x219   : > { %v606_v61 = vpop.permute.xlu1 %605  ;;  %v602_v62 = vpop.permute.xlu0 %601 }
 0x21a   : > { %616 = vst.msk [vmem:[#allocation2 + $0x20] sm:$0xff] %vm612_vm1, %v606_v61  ;;  %614 = vst.msk [vmem:[#allocation2 + $0x10] sm:$0xff] %vm612_vm1, %v602_v62 }
 0x21d   : > { %v658_v1 = vld [vmem:[#allocation2 + $0x18] sm:$0xff]  ;;  %v652_v2 = vld [vmem:[#allocation2 + $0x8] sm:$0xff]  ;;  %v688_v15 = vpop.permute.xlu0 %687  ;;  %v690_v21 = vpop.permute.xlu1 %689 }
 0x21e   : > { %v659_v3 = vsel %vm2718_vm4, %v637_v52, %v658_v1  ;;  %v653_v4 = vsel %vm2718_vm4, %v623_v51, %v652_v2 }
 0x21f   : > { %660 = vst [vmem:[#allocation2 + $0x18] sm:$0xff] %v659_v3  ;;  %654 = vst [vmem:[#allocation2 + $0x8] sm:$0xff] %v653_v4 }
 0x221   : > { %v661_v5 = vld [vmem:[#allocation2 + $0x20] sm:$0xff]  ;;  %v655_v7 = vld [vmem:[#allocation2 + $0x10] sm:$0xff]  ;;  %v692_v24 = vpop.permute.xlu0 %691  ;;  %v694_v29 = vpop.permute.xlu1 %693 }
 0x222   : > { %v662_v8 = vsel %vm2718_vm4, %v644_v50, %v661_v5  ;;  %v656_v9 = vsel %vm2718_vm4, %v630_v49, %v655_v7 }
 0x223   : > { %663 = vst [vmem:[#allocation2 + $0x20] sm:$0xff] %v662_v8  ;;  %657 = vst [vmem:[#allocation2 + $0x10] sm:$0xff] %v656_v9 }
 0x226   : > { %v673_v11 = vld [vmem:[#allocation2 + $0x18] sm:$0x1]  ;;  %v667_v12 = vld [vmem:[#allocation2 + $0x8] sm:$0x1] }
 0x227   : > { %v674_v13 = vsel %vm2730_vm7, 0, %v673_v11  ;;  %v668_v14 = vsel %vm2730_vm7, 0, %v667_v12 }
 0x228   : > { %675 = vst [vmem:[#allocation2 + $0x18] sm:$0x1] %v674_v13  ;;  %669 = vst [vmem:[#allocation2 + $0x8] sm:$0x1] %v668_v14 }
 0x22a   : > { %v676_v16 = vld [vmem:[#allocation2 + $0x20] sm:$0x1]  ;;  %v670_v17 = vld [vmem:[#allocation2 + $0x10] sm:$0x1] }
 0x22b   : > { %v677_v18 = vsel %vm2730_vm7, 0, %v676_v16  ;;  %v671_v19 = vsel %vm2730_vm7, 0, %v670_v17 }
 0x22c   : > { %678 = vst [vmem:[#allocation2 + $0x20] sm:$0x1] %v677_v18  ;;  %672 = vst [vmem:[#allocation2 + $0x10] sm:$0x1] %v671_v19 }
 0x22f   : > { %v702_v22 = vld [vmem:[#allocation2 + $0x8] sm:$0xff]  ;;  %v708_v23 = vld [vmem:[#allocation2 + $0x18] sm:$0xff] }
 0x230   : > { %v703_v25 = vsel %vm2742_vm10, %v688_v15, %v702_v22  ;;  %v709_v26 = vsel %vm2742_vm10, %v692_v24, %v708_v23 }
 0x231   : > { %704 = vst [vmem:[#allocation2 + $0x8] sm:$0xff] %v703_v25  ;;  %710 = vst [vmem:[#allocation2 + $0x18] sm:$0xff] %v709_v26 }
 0x233   : > { %v705_v27 = vld [vmem:[#allocation2 + $0x10] sm:$0xff]  ;;  %v711_v28 = vld [vmem:[#allocation2 + $0x20] sm:$0xff] }
 0x234   : > { %v706_v30 = vsel %vm2742_vm10, %v690_v21, %v705_v27  ;;  %v712_v31 = vsel %vm2742_vm10, %v694_v29, %v711_v28 }
 0x235   : > { %707 = vst [vmem:[#allocation2 + $0x10] sm:$0xff] %v706_v30  ;;  %713 = vst [vmem:[#allocation2 + $0x20] sm:$0xff] %v712_v31 }
 0x238   : > { %v717_v33 = vld [vmem:[#allocation2 + $0x8] sm:$0x80]  ;;  %v723_v34 = vld [vmem:[#allocation2 + $0x18] sm:$0x80]  ;;  %732 = sbr.rel (%p1661_p3) target bundleno = 800 (0x320), region = 68 }
 0x239   : > { %v718_v35 = vsel %vm2754_vm13, 0, %v717_v33  ;;  %v724_v36 = vsel %vm2754_vm13, 0, %v723_v34 }
 0x23a   : > { %719 = vst [vmem:[#allocation2 + $0x8] sm:$0x80] %v718_v35  ;;  %725 = vst [vmem:[#allocation2 + $0x18] sm:$0x80] %v724_v36 }
 0x23c   : > { %v720_v37 = vld [vmem:[#allocation2 + $0x10] sm:$0x80]  ;;  %v726_v38 = vld [vmem:[#allocation2 + $0x20] sm:$0x80] }
 0x23d   : > { %v721_v39 = vsel %vm2754_vm13, 0, %v720_v37  ;;  %v727_v40 = vsel %vm2754_vm13, 0, %v726_v38 }
 0x23e   : > { %722 = vst [vmem:[#allocation2 + $0x10] sm:$0x80] %v721_v39  ;;  %728 = vst [vmem:[#allocation2 + $0x20] sm:$0x80] %v727_v40 }
 0x27f   : > { %v785_v44 = vpop.f32.mrb[0].mxu0 }
 0x280   : > { %v786_v45 = vadd.f32 %v2699_v6, %v785_v44  ;;  %v1783_v46 = vpop.f32.mrb[1].mxu0 }
 0x281   : > { %v788_v47 = vpop.f32.mrb[2].mxu0 }
 0x282   : > { %v789_v48 = vadd.f32 %v2699_v6, %v788_v47  ;;  %v1784_v49 = vpop.f32.mrb[3].mxu0  ;;  %v792_v50 = vmax.f32 %v786_v45, 0.0 }
 0x284   : > { %v793_v51 = vmax.f32 %v789_v48, 0.0 }
 0x286   : > { %v794_v52 = vpack.c.bf16 %v793_v51, %v792_v50 }
 0x288   : > { %v804_v53 = vshll.u32 %v794_v52, 16  ;;  %796 = vrot.lane.b32.xlu0 %v794_v52, %s2255_s20  ;;  %v801_v54 = vshrl.u32 %v794_v52, 16 }
 0x28a   : > { %v814_v55 = vrot.slane %v804_v53, 1  ;;  %v803_v56 = vrot.slane %v801_v54, 7 }
 0x28c   : > { %v815_v57 = vor.u32 %v814_v55, %v801_v54  ;;  %v806_v58 = vor.u32 %v804_v53, %v803_v56 }
 0x28e   : > { %816 = vrot.lane.b32.xlu0 %v815_v57, %s2256_s25 }
 0x2fa   : > { %v797_v59 = vpop.permute.xlu0 %796 }
 0x2fb   : > { %799 = vst.msk [vmem:[#allocation2] sm:$0xff] %vm612_vm1, %v797_v59 }
 0x300   : > { %v817_v2 = vpop.permute.xlu0 %816 }
 0x302   : > { %v808_v60 = vld [vmem:[#allocation2] sm:$0xff] }
 0x303   : > { %v809_v61 = vsel %vm2718_vm4, %v806_v58, %v808_v60 }
 0x304   : > { %810 = vst [vmem:[#allocation2] sm:$0xff] %v809_v61 }
 0x30b   : > { %v811_v62 = vld [vmem:[#allocation2] sm:$0x1] }
 0x30c   : > { %v812_v1 = vsel %vm2730_vm7, 0, %v811_v62 }
 0x30d   : > { %813 = vst [vmem:[#allocation2] sm:$0x1] %v812_v1 }
 0x314   : > { %v819_v3 = vld [vmem:[#allocation2] sm:$0xff] }
 0x315   : > { %v820_v4 = vsel %vm2742_vm10, %v817_v2, %v819_v3 }
 0x316   : > { %821 = vst [vmem:[#allocation2] sm:$0xff] %v820_v4 }
 0x31d   : > { %v822_v5 = vld [vmem:[#allocation2] sm:$0x80] }
 0x31e   : > { %v823_v7 = vsel %vm2754_vm13, 0, %v822_v5 }
 0x31f   : > { %824 = vst [vmem:[#allocation2] sm:$0x80] %v823_v7 }
 0x320 PF: > { %s3079_s22 = sld [smem:[#allocation17_spill]] }
 0x326   : > { %p1665_p9 = scmp.ne.s32.totalorder %s3079_s22, 0 }
 0x327   : > { %vm829_vm15 = vcmask (!%p1665_p9), 97280   ;;  %v2257_v8 = vmov (!%p1665_p9), 0  }
 0x328   : > { %828 = sbr.rel (%p1665_p9) target bundleno = 815 (0x32f), region = 72  ;;  %830 = vst.msk [vmem:[#allocation2] sm:$0xff] (!%p1665_p9), %vm829_vm15, %v2257_v8 }
 0x32f PF: > { %s3080_s17 = sld [smem:[#allocation17_spill]] }
 0x335   : > { %p1666_p7 = scmp.ge.s32.totalorder %s3080_s17, 3 }
 0x336   : > { %s3081_s16 = sld [smem:[#allocation30_spill]] (!%p1666_p7)  ;;  %v2258_v11 = vmov (!%p1666_p7), 0.0   ;;  %v1996_v12 = vld [vmem:[%s409_s26] sm:$0xff] (!%p1666_p7)   ;;  %vm2259_vm3 = vmmov (!%p1666_p7), 0   ;;  %s2260_s5 = smov (!%p1666_p7), 4  }
 0x337   : > { %834 = sbr.rel (%p1666_p7) target bundleno = 1204 (0x4b4), region = 76  ;;  %1785 = vmatprep.subr.bf16.mxu0 (!%p1666_p7), %v2258_v11  ;;  %1787 = vmatprep.mubr.msk.bf16.mxu0 (!%p1666_p7), %vm2259_vm3, %v2258_v11  ;;  %s2261_s7 = smov (!%p1666_p7), 8  }
 0x33c   : > { %v1995_v9 = vld [vmem:[%s3081_s16] sm:$0xff] (!%p1666_p7)  }
 0x33d   : > { %1786 = vmatpush3.bf16.msra.mxu0 (!%p1666_p7), %v1995_v9 }
 0x340   : > { %1788 = vmatmul.mubr.msk.bf16.vlgmr.msra.gmra.mrb[0].mxu0 %vm505_vm0, %v1996_v12 }
 0x413   : > { %v887_v13 = vpop.f32.mrb[0].mxu0 }
 0x414   : > { %v888_v14 = vadd.f32 %v2699_v6, %v887_v13  ;;  %v1789_v15 = vpop.f32.mrb[1].mxu0 }
 0x415   : > { %v890_v16 = vpop.f32.mrb[2].mxu0 }
 0x416   : > { %v891_v17 = vadd.f32 %v2699_v6, %v890_v16  ;;  %v1790_v18 = vpop.f32.mrb[3].mxu0  ;;  %v894_v19 = vmax.f32 %v888_v14, 0.0 }
 0x418   : > { %v895_v21 = vmax.f32 %v891_v17, 0.0 }
 0x41a   : > { %v896_v22 = vpack.c.bf16 %v895_v21, %v894_v19 }
 0x41c   : > { %v907_v23 = vshll.u32 %v896_v22, 16  ;;  %898 = vrot.lane.b32.xlu0 %v896_v22, %s2260_s5  ;;  %v904_v24 = vshrl.u32 %v896_v22, 16 }
 0x41e   : > { %v917_v25 = vrot.slane %v907_v23, 1  ;;  %v906_v26 = vrot.slane %v904_v24, 7 }
 0x420   : > { %v918_v27 = vor.u32 %v917_v25, %v904_v24  ;;  %v909_v28 = vor.u32 %v907_v23, %v906_v26 }
 0x422   : > { %919 = vrot.lane.b32.xlu0 %v918_v27, %s2261_s7 }
 0x48e   : > { %v899_v29 = vpop.permute.xlu0 %898 }
 0x48f   : > { %902 = vst.msk [vmem:[#allocation2 + $0x28] sm:$0xff] %vm612_vm1, %v899_v29 }
 0x494   : > { %v920_v34 = vpop.permute.xlu0 %919 }
 0x496   : > { %v911_v30 = vld [vmem:[#allocation2 + $0x28] sm:$0xff] }
 0x497   : > { %v912_v6 = vsel %vm2718_vm4, %v909_v28, %v911_v30 }
 0x498   : > { %913 = vst [vmem:[#allocation2 + $0x28] sm:$0xff] %v912_v6 }
 0x49f   : > { %v914_v31 = vld [vmem:[#allocation2 + $0x28] sm:$0x1] }
 0x4a0   : > { %v915_v33 = vsel %vm2730_vm7, 0, %v914_v31 }
 0x4a1   : > { %916 = vst [vmem:[#allocation2 + $0x28] sm:$0x1] %v915_v33 }
 0x4a8   : > { %v922_v35 = vld [vmem:[#allocation2 + $0x28] sm:$0xff] }
 0x4a9   : > { %v923_v36 = vsel %vm2742_vm10, %v920_v34, %v922_v35 }
 0x4aa   : > { %924 = vst [vmem:[#allocation2 + $0x28] sm:$0xff] %v923_v36 }
 0x4b1   : > { %v925_v37 = vld [vmem:[#allocation2 + $0x28] sm:$0x80] }
 0x4b2   : > { %v926_v38 = vsel %vm2754_vm13, 0, %v925_v37 }
 0x4b3   : > { %927 = vst [vmem:[#allocation2 + $0x28] sm:$0x80] %v926_v38 }
 0x4b4 PF: > { %s3082_s26 = sld [smem:[#allocation17_spill]] }
 0x4ba   : > { %p1670_p6 = scmp.ne.s32.totalorder %s3082_s26, 3 }
 0x4bb   : > { %vm933_vm0 = vcmask (!%p1670_p6), 97280   ;;  %v2262_v63 = vmov (!%p1670_p6), 0  }
 0x4bc   : > { %931 = sbr.rel (%p1670_p6) target bundleno = 1219 (0x4c3), region = 80  ;;  %934 = vst.msk [vmem:[#allocation2 + $0x28] sm:$0xff] (!%p1670_p6), %vm933_vm0, %v2262_v63 }
 0x4c3 PF: > { %s3083_s9 = sld [smem:[#allocation32_spill]]  ;;  %vm959_vm1 = vcmask 1045504   ;;  %v935_v20 = vld [vmem:[#allocation2] sm:$0xff]  ;;  %vm946_vm4 = vcmask 97280   ;;  %v936_v32 = vld [vmem:[#allocation2 + $0x8] sm:$0xff]  ;;  %v1046_v44 = vld [vmem:[#allocation2 + $0x10] sm:$0xff] }
 0x4c4   : > { %1793 = vmatprep.mubr.msk.bf16.mxu0 %vm946_vm4, %v935_v20  ;;  %1803 = vmatprep.mubr.msk.bf16.mxu1 %vm946_vm4, %v936_v32  ;;  %v938_v45 = vld [vmem:[#allocation2 + $0x18] sm:$0xff]  ;;  %v1048_v46 = vld [vmem:[#allocation2 + $0x20] sm:$0xff]  ;;  %v1165_v47 = vld [vmem:[#allocation2 + $0x28] sm:$0xff]  ;;  %s3085_s27 = sld [smem:[#allocation33_spill]]  ;;  %vm1322_vm5 = vcmask 1041408   ;;  %s3086_s5 = sld [smem:[#allocation34_spill]] }
 0x4c5   : > { %s3087_s7 = sld [smem:[#allocation17_spill]]  ;;  %s3088_s26 = sld [smem:[#allocation18_spill]] }
 0x4c6   : > { %s1481_s19 = sshll.u32 %s2768_s14, 4  ;;  %s3089_s25 = sld [smem:[#allocation35_spill]]  ;;  %s2895_s19 = int_to_ptr.vmem [resolvable:$true] %s1481_s19 }
 0x4c7   : > { %s1465_s17 = scalar_lea.sflag [#allocation6], %s2651_s6  ;;  %p3090_p0 = scmp.ne.s32.totalorder %s3044_s15, 0 }
 0x4c8   : > { %s2263_s24 = smov [#allocation10]  }
 0x4c9   : > { %s3084_s4 = smov %s3083_s9  ;;  %v1997_v10 = vld [vmem:[%s3083_s9] sm:$0x3f]   ;;  %s2094_s16 = sshll.u32 %s2263_s24, 4  ;;  %s2095_s16 = int_to_ptr.vmem [resolvable:$false] %s2094_s16 }
 0x4ca   : > { %1833 = vmatprep.subr.msk.bf16.mxu0 %vm959_vm1, %v1997_v10  ;;  %v961_v39 = vsel %vm959_vm1, %v1997_v10, 0  ;;  %v1998_v40 = vld [vmem:[%s3084_s4 + $0x8] sm:$0x3f]   ;;  %v1999_v41 = vld [vmem:[%s3084_s4 + $0x10] sm:$0x3f]   ;;  %p2097_p2 = scmp.lt.s32.totalorder %s2895_s19, %s2095_s16 }
 0x4cb   : > { %1792 = vmatpush3.bf16.msra.mxu0 %v961_v39  ;;  %1834 = vmatprep.subr.msk.bf16.mxu1 %vm959_vm1, %v1998_v40  ;;  %v1070_v42 = vsel %vm959_vm1, %v1998_v40, 0  ;;  %v1187_v43 = vsel %vm959_vm1, %v1999_v41, 0  ;;  %v1302_v48 = vld [vmem:[%s3085_s27] sm:$0x3]  ;;  %s1720_s13 = sshll.u32 %s3087_s7, 3  ;;  %s1707_s3 = sshll.u32 %s3088_s26, 5 }
 0x4cc   : > { %1835 = vmatprep.subr.msk.bf16.mxu0 %vm959_vm1, %v1999_v41  ;;  %1802 = vmatpush3.bf16.msra.mxu1 %v1070_v42  ;;  %v1324_v49 = vsel %vm1322_vm5, %v1302_v48, 0  ;;  %s2090_s27 = scalar_lea.vmem %s2895_s19, 512 }
 0x4cd   : > { %1836 = vmatprep.subr.msk.bf16.mxu1 %vm1322_vm5, %v1302_v48  ;;  %p2091_p4 = scmp.ne.s32.totalorder %s2895_s19, %s2090_s27 }
 0x4ce   : > { %1794 = vmatmul.mubr.msk.bf16.vlgmr.msra.gmra.mrb[0].mxu0 %vm946_vm4, %v936_v32 }
 0x4cf   : > { %1812 = vmatpush3.bf16.msra.mxu0 %v1187_v43  ;;  %1797 = vmatprep.mubr.msk.bf16.mxu0 %vm946_vm4, %v1046_v44  ;;  %p2092_p12 = pnand %p2091_p4, %p3090_p0 }
 0x4d0   : > { %1804 = vmatmul.mubr.msk.bf16.vlgmr.msra.gmra.mrb[0].mxu1 %vm946_vm4, %v1046_v44 }
 0x4d1   : > { %1807 = vmatprep.mubr.msk.bf16.mxu1 %vm946_vm4, %v938_v45  ;;  %1822 = vmatpush3.bf16.msra.mxu1 %v1324_v49  ;;  %p2093_p11 = pneg %p2092_p12 }
 0x4d6   : > { %1798 = vmatmul.mubr.msk.bf16.gmra.mrb[4].mxu0 %vm946_vm4, %v938_v45 }
 0x4d7   : > { %1813 = vmatprep.mubr.msk.bf16.mxu0 %vm946_vm4, %v1046_v44 }
 0x4d8   : > { %1808 = vmatmul.mubr.msk.bf16.gmra.mrb[4].mxu1 %vm946_vm4, %v1048_v46 }
 0x4de   : > { %1814 = vmatmul.mubr.msk.bf16.vlgmr.msra.gmra.mrb[8].mxu0 %vm946_vm4, %v938_v45 }
 0x4df   : > { %1817 = vmatprep.mubr.msk.bf16.mxu0 %vm946_vm4, %v1048_v46 }
 0x4e6   : > { %1818 = vmatmul.mubr.msk.bf16.gmra.mrb[12].mxu0 %vm946_vm4, %v1165_v47 }
 0x5a1   : > { %v1795_v50 = vpop.f32.mrb[0].mxu0 }
 0x5a2   : > { %1031 = vst.msk [vmem:[#allocation3 + $0x10] sm:$0xff] %vm649_vm2, %v1795_v50  ;;  %v997_v51 = vpop.f32.mrb[1].mxu0 }
 0x5a3   : > { %1029 = vst.msk [vmem:[#allocation3] sm:$0xff] %vm649_vm2, %v997_v51  ;;  %v1796_v52 = vpop.f32.mrb[2].mxu0  ;;  %v1805_v53 = vpop.f32.mrb[0].mxu1 }
 0x5a4   : > { %1032 = vst.msk [vmem:[#allocation3 + $0x18] sm:$0xff] %vm649_vm2, %v1796_v52  ;;  %v1000_v54 = vpop.f32.mrb[3].mxu0  ;;  %v1106_v55 = vpop.f32.mrb[1].mxu1 }
 0x5a5   : > { %1030 = vst.msk [vmem:[#allocation3 + $0x8] sm:$0xff] %vm649_vm2, %v1000_v54  ;;  %v1806_v56 = vpop.f32.mrb[2].mxu1 }
 0x5a6   : > { %v1109_v57 = vpop.f32.mrb[3].mxu1 }
 0x5a9   : > { %v1039_v58 = vld [vmem:[#allocation3 + $0x10] sm:$0xff]  ;;  %v1799_v59 = vpop.f32.mrb[4].mxu0 }
 0x5aa   : > { %v1139_v60 = vadd.f32 %v1805_v53, %v1039_v58  ;;  %v1037_v61 = vld [vmem:[#allocation3] sm:$0xff]  ;;  %1035 = vst.msk [vmem:[#allocation3 + $0x30] sm:$0xff] %vm649_vm2, %v1799_v59  ;;  %v1013_v62 = vpop.f32.mrb[5].mxu0 }
 0x5ab   : > { %v1137_v1 = vadd.f32 %v1106_v55, %v1037_v61  ;;  %v1040_v2 = vld [vmem:[#allocation3 + $0x18] sm:$0xff]  ;;  %1033 = vst.msk [vmem:[#allocation3 + $0x20] sm:$0xff] %vm649_vm2, %v1013_v62  ;;  %v1800_v3 = vpop.f32.mrb[6].mxu0  ;;  %v1809_v4 = vpop.f32.mrb[4].mxu1 }
 0x5ac   : > { %1147 = vst.msk [vmem:[#allocation3 + $0x10] sm:$0xff] %vm649_vm2, %v1139_v60  ;;  %v1140_v5 = vadd.f32 %v1806_v56, %v1040_v2  ;;  %v1038_v7 = vld [vmem:[#allocation3 + $0x8] sm:$0xff]  ;;  %1036 = vst.msk [vmem:[#allocation3 + $0x38] sm:$0xff] %vm649_vm2, %v1800_v3  ;;  %v1016_v8 = vpop.f32.mrb[7].mxu0  ;;  %v1122_v9 = vpop.f32.mrb[5].mxu1 }
 0x5ad   : > { %1145 = vst.msk [vmem:[#allocation3] sm:$0xff] %vm649_vm2, %v1137_v1  ;;  %v1138_v11 = vadd.f32 %v1109_v57, %v1038_v7  ;;  %1034 = vst.msk [vmem:[#allocation3 + $0x28] sm:$0xff] %vm649_vm2, %v1016_v8  ;;  %v1810_v12 = vpop.f32.mrb[6].mxu1 }
 0x5ae   : > { %1148 = vst.msk [vmem:[#allocation3 + $0x18] sm:$0xff] %vm649_vm2, %v1140_v5  ;;  %v1125_v13 = vpop.f32.mrb[7].mxu1 }
 0x5af   : > { %1146 = vst.msk [vmem:[#allocation3 + $0x8] sm:$0xff] %vm649_vm2, %v1138_v11  ;;  %v1737_v11 = vld [vmem:[%s2657_s21 + $0x8] sm:$0xff]  }
 0x5b1   : > { %v1043_v14 = vld [vmem:[#allocation3 + $0x30] sm:$0xff]  ;;  %v1815_v15 = vpop.f32.mrb[8].mxu0 }
 0x5b2   : > { %v1143_v16 = vadd.f32 %v1809_v4, %v1043_v14  ;;  %v1041_v17 = vld [vmem:[#allocation3 + $0x20] sm:$0xff]  ;;  %v1223_v18 = vpop.f32.mrb[9].mxu0  ;;  %v1727_v14 = vunpack.c.l.bf16 %v1737_v11 }
 0x5b3   : > { %v1141_v19 = vadd.f32 %v1122_v9, %v1041_v17  ;;  %v1044_v21 = vld [vmem:[#allocation3 + $0x38] sm:$0xff]  ;;  %v1155_v22 = vld [vmem:[#allocation3 + $0x10] sm:$0xff]  ;;  %v1816_v23 = vpop.f32.mrb[10].mxu0 }
 0x5b4   : > { %1151 = vst.msk [vmem:[#allocation3 + $0x30] sm:$0xff] %vm649_vm2, %v1143_v16  ;;  %v1144_v24 = vadd.f32 %v1810_v12, %v1044_v21  ;;  %v1042_v25 = vld [vmem:[#allocation3 + $0x28] sm:$0xff]  ;;  %v1256_v26 = vadd.f32 %v1815_v15, %v1155_v22  ;;  %v1153_v27 = vld [vmem:[#allocation3] sm:$0xff]  ;;  %v1226_v28 = vpop.f32.mrb[11].mxu0 }
 0x5b5   : > { %1149 = vst.msk [vmem:[#allocation3 + $0x20] sm:$0xff] %vm649_vm2, %v1141_v19  ;;  %v1142_v29 = vadd.f32 %v1125_v13, %v1042_v25  ;;  %v1254_v30 = vadd.f32 %v1223_v18, %v1153_v27  ;;  %v1156_v6 = vld [vmem:[#allocation3 + $0x18] sm:$0xff]  ;;  %v1722_v12 = vld [vmem:[%s2657_s21] sm:$0xff]   ;;  %v1691_v13 = vld [vmem:[%s3086_s5] ss:$0 sm:$0xff]  ;;  %v1728_v18 = vunpack.c.h.bf16 %v1737_v11  ;;  %s2096_s5 = scalar_lea.vmem %s2095_s16, 1024 }
 0x5b6   : > { %1152 = vst.msk [vmem:[#allocation3 + $0x38] sm:$0xff] %vm649_vm2, %v1144_v24  ;;  %1264 = vst.msk [vmem:[#allocation3 + $0x10] sm:$0xff] %vm649_vm2, %v1256_v26  ;;  %v1257_v31 = vadd.f32 %v1816_v23, %v1156_v6  ;;  %v1154_v33 = vld [vmem:[#allocation3 + $0x8] sm:$0xff]  ;;  %v1724_v22 = vunpack.c.h.bf16 %v1722_v12  ;;  %v1738_v6 = vld [vmem:[%s2657_s21 + $0x10] sm:$0xff]   ;;  %p2098_p1 = scmp.lt.s32.totalorder %s2096_s5, %s2090_s27 }
 0x5b7   : > { %1150 = vst.msk [vmem:[#allocation3 + $0x28] sm:$0xff] %vm649_vm2, %v1142_v29  ;;  %1262 = vst.msk [vmem:[#allocation3] sm:$0xff] %vm649_vm2, %v1254_v30  ;;  %v1255_v34 = vadd.f32 %v1226_v28, %v1154_v33  ;;  %v1739_v28 = vld [vmem:[%s2657_s21 + $0x18] sm:$0xff]   ;;  %s1478_s21 = sadd.s32 %s1720_s13, %s1707_s3 }
 0x5b8   : > { %1265 = vst.msk [vmem:[#allocation3 + $0x18] sm:$0xff] %vm649_vm2, %v1257_v31  ;;  %s1708_s9 = sshll.u32 %s1478_s21, 6  ;;  %p2099_p5 = por %p2098_p1, %p2097_p2 }
 0x5b9   : > { %1263 = vst.msk [vmem:[#allocation3 + $0x8] sm:$0xff] %vm649_vm2, %v1255_v34  ;;  %v1819_v35 = vpop.f32.mrb[12].mxu0  ;;  %s2891_s22 = scalar_lea.hbm %s3089_s25, %s1708_s9 }
 0x5ba   : > { %v1239_v36 = vpop.f32.mrb[13].mxu0  ;;  %p2100_p8 = pnand %p2099_p5, %p2093_p11 }
 0x5bb   : > { %v1159_v37 = vld [vmem:[#allocation3 + $0x30] sm:$0xff]  ;;  %v1820_v38 = vpop.f32.mrb[14].mxu0 }
 0x5bc   : > { %v1260_v63 = vadd.f32 %v1819_v35, %v1159_v37  ;;  %v1157_v10 = vld [vmem:[#allocation3 + $0x20] sm:$0xff]  ;;  %v1242_v20 = vpop.f32.mrb[15].mxu0 }
 0x5bd   : > { %v1258_v39 = vadd.f32 %v1239_v36, %v1157_v10  ;;  %v1160_v32 = vld [vmem:[#allocation3 + $0x38] sm:$0xff]  ;;  %v1272_v40 = vld [vmem:[#allocation3 + $0x10] sm:$0xff]  ;;  %v1735_v36 = vunpack.c.l.bf16 %v1739_v28  ;;  %v1731_v10 = vunpack.c.l.bf16 %v1738_v6 }
 0x5be   : > { %1268 = vst.msk [vmem:[#allocation3 + $0x30] sm:$0xff] %vm649_vm2, %v1260_v63  ;;  %v1261_v41 = vadd.f32 %v1820_v38, %v1160_v32  ;;  %v1158_v42 = vld [vmem:[#allocation3 + $0x28] sm:$0xff]  ;;  %v1270_v43 = vld [vmem:[#allocation3] sm:$0xff]  ;;  %v1284_v48 = vadd.f32 %v2683_v0, %v1272_v40  ;;  %v1736_v40 = vunpack.c.h.bf16 %v1739_v28 }
 0x5bf   : > { %1266 = vst.msk [vmem:[#allocation3 + $0x20] sm:$0xff] %vm649_vm2, %v1258_v39  ;;  %v1259_v44 = vadd.f32 %v1242_v20, %v1158_v42  ;;  %v1282_v45 = vadd.f32 %v2683_v0, %v1270_v43  ;;  %v1273_v46 = vld [vmem:[#allocation3 + $0x18] sm:$0xff] }
 0x5c0   : > { %1269 = vst.msk [vmem:[#allocation3 + $0x38] sm:$0xff] %vm649_vm2, %v1261_v41  ;;  %v1271_v47 = vld [vmem:[#allocation3 + $0x8] sm:$0xff]  ;;  %v1285_v49 = vadd.f32 %v2683_v0, %v1273_v46  ;;  %v1292_v54 = vmax.f32 %v1284_v48, 0.0 }
 0x5c1   : > { %1267 = vst.msk [vmem:[#allocation3 + $0x28] sm:$0xff] %vm649_vm2, %v1259_v44  ;;  %v1283_v50 = vadd.f32 %v2683_v0, %v1271_v47  ;;  %v1290_v52 = vmax.f32 %v1282_v45, 0.0  ;;  %v1732_v44 = vunpack.c.h.bf16 %v1738_v6 }
 0x5c2   : > { %v1293_v51 = vmax.f32 %v1285_v49, 0.0 }
 0x5c3   : > { %v1291_v53 = vmax.f32 %v1283_v50, 0.0 }
 0x5c4   : > { %v1299_v57 = vpack.c.bf16 %v1293_v51, %v1292_v54 }
 0x5c5   : > { %v1298_v55 = vpack.c.bf16 %v1291_v53, %v1290_v52  ;;  %v1276_v56 = vld [vmem:[#allocation3 + $0x30] sm:$0xff] }
 0x5c6   : > { %v1274_v58 = vld [vmem:[#allocation3 + $0x20] sm:$0xff]  ;;  %v1288_v62 = vadd.f32 %v2683_v0, %v1276_v56 }
 0x5c7   : > { %1823 = vmatprep.mubr.msk.bf16.mxu1 %vm649_vm2, %v1298_v55  ;;  %v1286_v59 = vadd.f32 %v2683_v0, %v1274_v58  ;;  %v1277_v60 = vld [vmem:[#allocation3 + $0x38] sm:$0xff] }
 0x5c8   : > { %1824 = vmatmul.mubr.msk.bf16.vlgmr.msra.gmra.mrb[8].mxu1 %vm649_vm2, %v1299_v57  ;;  %v1275_v61 = vld [vmem:[#allocation3 + $0x28] sm:$0xff]  ;;  %v1289_v1 = vadd.f32 %v2683_v0, %v1277_v60  ;;  %v1296_v7 = vmax.f32 %v1288_v62, 0.0 }
 0x5c9   : > { %v1287_v2 = vadd.f32 %v2683_v0, %v1275_v61  ;;  %v1294_v4 = vmax.f32 %v1286_v59, 0.0  ;;  %v1723_v0 = vunpack.c.l.bf16 %v1722_v12 }
 0x5ca   : > { %v1297_v3 = vmax.f32 %v1289_v1, 0.0 }
 0x5cb   : > { %v1295_v5 = vmax.f32 %v1287_v2, 0.0 }
 0x5cc   : > { %v1301_v9 = vpack.c.bf16 %v1297_v3, %v1296_v7 }
 0x5cd   : > { %v1300_v8 = vpack.c.bf16 %v1295_v5, %v1294_v4 }
 0x5cf   : > { %1827 = vmatprep.mubr.msk.bf16.mxu1 %vm649_vm2, %v1300_v8 }
 0x5d0   : > { %1828 = vmatmul.mubr.msk.bf16.gmra.mrb[12].mxu1 %vm649_vm2, %v1301_v9  ;;  %vm1455_vm2 = vcmask 125952  }
 0x69b   : > { %v1825_v15 = vpop.f32.mrb[8].mxu1 }
 0x69c   : > { %v1369_v16 = vadd.f32 %v1825_v15, %v1691_v13  ;;  %v1360_v17 = vpop.f32.mrb[9].mxu1 }
 0x69d   : > { %v1361_v19 = vadd.f32 %v1691_v13, %v1360_v17  ;;  %v1826_v21 = vpop.f32.mrb[10].mxu1 }
 0x69e   : > { %v1409_v23 = vadd.f32 %v1727_v14, %v1369_v16  ;;  %v1372_v24 = vadd.f32 %v1826_v21, %v1691_v13  ;;  %v1363_v25 = vpop.f32.mrb[11].mxu1 }
 0x69f   : > { %v1407_v26 = vadd.f32 %v1723_v0, %v1361_v19  ;;  %v1364_v27 = vadd.f32 %v1691_v13, %v1363_v25 }
 0x6a0   : > { %v1417_v29 = vmax.f32 %v1409_v23, 0.0  ;;  %v1410_v30 = vadd.f32 %v1728_v18, %v1372_v24 }
 0x6a1   : > { %v1415_v31 = vmax.f32 %v1407_v26, 0.0  ;;  %v1408_v33 = vadd.f32 %v1724_v22, %v1364_v27 }
 0x6a2   : > { %v1714_v34 = vpack.c.bf16 %v1417_v29, %v1417_v29  ;;  %v1418_v35 = vmax.f32 %v1410_v30, 0.0 }
 0x6a3   : > { %v1712_v37 = vpack.c.bf16 %v1415_v31, %v1415_v31  ;;  %v1416_v38 = vmax.f32 %v1408_v33, 0.0  ;;  %v1829_v63 = vpop.f32.mrb[12].mxu1 }
 0x6a4   : > { %1458 = vst.msk [vmem:[%s2768_s14 + $0x8] sm:$0xf] %vm1455_vm2, %v1714_v34  ;;  %v1715_v20 = vpack.c.bf16 %v1418_v35, %v1418_v35  ;;  %v1385_v39 = vadd.f32 %v1829_v63, %v1691_v13  ;;  %v1376_v32 = vpop.f32.mrb[13].mxu1 }
 0x6a5   : > { %1456 = vst.msk [vmem:[%s2768_s14] sm:$0xf] %vm1455_vm2, %v1712_v37  ;;  %v1713_v41 = vpack.c.bf16 %v1416_v38, %v1416_v38  ;;  %v1377_v42 = vadd.f32 %v1691_v13, %v1376_v32  ;;  %v1830_v43 = vpop.f32.mrb[14].mxu1 }
 0x6a6   : > { %1459 = vst.msk [vmem:[%s2768_s14 + $0xc] sm:$0xf] %vm1455_vm2, %v1715_v20  ;;  %v1413_v45 = vadd.f32 %v1735_v36, %v1385_v39  ;;  %v1388_v46 = vadd.f32 %v1830_v43, %v1691_v13  ;;  %v1379_v47 = vpop.f32.mrb[15].mxu1 }
 0x6a7   : > { %1457 = vst.msk [vmem:[%s2768_s14 + $0x4] sm:$0xf] %vm1455_vm2, %v1713_v41  ;;  %v1411_v48 = vadd.f32 %v1731_v10, %v1377_v42  ;;  %v1380_v49 = vadd.f32 %v1691_v13, %v1379_v47 }
 0x6a8   : > { %v1421_v50 = vmax.f32 %v1413_v45, 0.0  ;;  %v1414_v51 = vadd.f32 %v1736_v40, %v1388_v46 }
 0x6a9   : > { %v1419_v52 = vmax.f32 %v1411_v48, 0.0  ;;  %v1412_v53 = vadd.f32 %v1732_v44, %v1380_v49 }
 0x6aa   : > { %v1718_v54 = vpack.c.bf16 %v1421_v50, %v1421_v50  ;;  %v1422_v55 = vmax.f32 %v1414_v51, 0.0 }
 0x6ab   : > { %v1716_v56 = vpack.c.bf16 %v1419_v52, %v1419_v52  ;;  %v1420_v57 = vmax.f32 %v1412_v53, 0.0 }
 0x6ac   : > { %1462 = vst.msk [vmem:[%s2768_s14 + $0x18] sm:$0xf] %vm1455_vm2, %v1718_v54  ;;  %v1719_v58 = vpack.c.bf16 %v1422_v55, %v1422_v55 }
 0x6ad   : > { %1460 = vst.msk [vmem:[%s2768_s14 + $0x10] sm:$0xf] %vm1455_vm2, %v1716_v56  ;;  %v1717_v59 = vpack.c.bf16 %v1420_v57, %v1420_v57 }
 0x6ae   : > { %1463 = vst.msk [vmem:[%s2768_s14 + $0x1c] sm:$0xf] %vm1455_vm2, %v1719_v58 }
 0x6af   : > { %1461 = vst.msk [vmem:[%s2768_s14 + $0x14] sm:$0xf] %vm1455_vm2, %v1717_v59 }
 0x6b0   : > { %2103 = shalt.err (!%p2100_p8)
}
 0x6b1   : > { %s2104_s14 = scalar_lea.hbm %s2891_s22, 512  ;;  %s2108_s13 = scalar_lea.hbm %s3089_s25, 4096 }
 0x6b2   : > { %p2105_p13 = scmp.ne.s32.totalorder %s2891_s22, %s2104_s14  ;;  %p2109_p9 = scmp.lt.u32.totalorder %s2891_s22, %s3089_s25 }
 0x6b3   : > { %p2110_p7 = scmp.lt.u32.totalorder %s2108_s13, %s2104_s14  ;;  %p2112_p4 = scmp.lt.u32.totalorder %s2104_s14, %s2891_s22 }
 0x6b4   : > { %p2106_p10 = pnand %p2105_p13, %p3090_p0 }
 0x6b5   : > { %p2111_p6 = por %p2110_p7, %p2109_p9 }
 0x6b6   : > { %p2107_p3 = pneg %p2106_p10 }
 0x6b7   : > { %p2113_p12 = por %p2112_p4, %p2111_p6 }
 0x6b9   : > { %p2114_p11 = pnand %p2113_p12, %p2107_p3 }
 0x6bb   : > { %2117 = shalt.err (!%p2114_p11)
}
 0x6bc   : > { %s2264_s9 = smov 64  }
 0x6bd   : > { %1843 = dma.vmem_to_hbm [thread:$0]  (%p3090_p0), %s2895_s19, 512, %s2891_s22, %s1465_s17, %s2264_s9, %s2264_s9, %s2251_s8  }
 0x6be PF: > { %p1860_p2 = scmp.ge.s32.totalorder %s2244_s18, 2  ;;  %s1496_s30 = sand.u32 1, %s2216_s11  }
 0x6bf   : > { %p3091_p1 = scmp.ne.s32.totalorder %s3045_s23, 0  ;;  %s1497_s20 = scalar_lea.sflag [#allocation6], %s1496_s30 }
 0x6c1   : > { %p1856_p5 = pnand %p1860_p2, %p3091_p1 }
 0x6c3   : > { %2187 = dma.done.wait (!%p1856_p5), %s1497_s20, 512  }
 0x6c4   : > { %2189 = vsyncadd (!%p1856_p5), %s1497_s20, 4294966784  ;;  %s27_s18 = sadd.s32 1, %s2244_s18   ;;  %s3093_s30 = sld [smem:[#allocation15_spill]] }
 0x6c5   : > { %p2931_p8 = scmp.ge.s32.totalorder %s27_s18, 10   ;;  %s3094_s6 = sld [smem:[#allocation25_spill]] }
 0x6c6   : > { %s3095_s8 = sld [smem:[#allocation16_spill]]  ;;  %s3096_s13 = sld [smem:[#allocation26_spill]] }
 0x6c7   : > { %s3097_s14 = sld [smem:[#allocation19_spill]]  ;;  %s3098_s23 = sld [smem:[#allocation20_spill]] }
 0x6c8   : > { %s3099_s16 = sld [smem:[#allocation21_spill]]  ;;  %s3100_s17 = sld [smem:[#allocation22_spill]] }
 0x6c9   : > { %s3102_s27 = smov %s2196_s28  ;;  %s3103_s28 = smov %s2200_s29 }
 0x6ca   : > { %s3104_s29 = smov %s2601_s1  ;;  %s3105_s9 = smov %s2212_s10 }
 0x6cb   : > { %s3106_s10 = smov %s3094_s6  ;;  %s3107_s11 = smov %s2220_s12 }
 0x6cc   : > { %s3108_s12 = smov %s3095_s8  ;;  %26 = sbr.rel (!%p2931_p8) target bundleno = 22 (0x16), region = 143 }
 0x6cd   : > { %s3109_s15 = smov %s3098_s23 }
 0x6d3   :  { %1502 = vsyncpa [#allocation5], 1 }
 0x6d4   :  { %1504 = vsyncpa [#allocation5 + $0x1], 1 }
 0x6d5   :  { %1505 = vsyncpa [#allocation8], 1 }
 0x6d6   :  { %1507 = vsyncpa [#allocation8 + $0x1], 1 }
 0x6d7   :  { %1508 = vsyncpa [#allocation6], 1 }
 0x6d8   :  { %1510 = vsyncpa [#allocation6 + $0x1], 1 }

</bundles_post_ra>
